<compile_context>
chip_gen: v7x
topology: tpu7x:2x2x1
jax: 0.10.0
libtpu: 0.0.40
codegen_flags: <defaults>
</compile_context>

<pallas_src>
import functools
import numpy as np

import jax
import jax.numpy as jnp
from jax.experimental import pallas as pl
from jax.experimental.pallas import tpu as pltpu

# ----------------------------- model config (small) --------------------------
VOCAB = 128
MAX_POS = 16
TYPE_VOCAB = 2
HIDDEN = 32
NUM_HEADS = 4
HEAD_DIM = HIDDEN // NUM_HEADS
INTERMEDIATE = 64
NUM_LAYERS = 2
NUM_CLASSES = 3
CLS_PAD = 128           # classifier lanes padded -> lane-dense store
LN_EPS = 1e-12          # BERT default
NEG_INF = -10000.0      # BERT additive-mask value


# ----------------------------- packed-slab layouts ----------------------------
def _build_layouts():
    mat = {}
    row = 0

    def add_mat(name, nrows, ncols):
        nonlocal row
        mat[name] = (row, nrows, ncols)
        row += nrows

    for l in range(NUM_LAYERS):
        add_mat(f"wq_t_{l}", HIDDEN, HIDDEN)        # Wq^T, pre-scaled by 1/sqrt(Dh)
        add_mat(f"wk_t_{l}", HIDDEN, HIDDEN)        # Wk^T
        add_mat(f"wv_t_{l}", HIDDEN, HIDDEN)        # Wv^T
        add_mat(f"wo_{l}", HIDDEN, HIDDEN)          # Wo (NH*Dh, H), natural
        add_mat(f"ff1_{l}", HIDDEN, INTERMEDIATE)
        add_mat(f"ff2_{l}", INTERMEDIATE, HIDDEN)
    add_mat("pool_w", HIDDEN, HIDDEN)
    add_mat("cls_w", HIDDEN, CLS_PAD)
    mat_rows = row

    vec = {}
    idx = 0

    def add_vec(name, width):
        nonlocal idx
        vec[name] = (idx, width)
        idx += 1

    add_vec("emb_g", HIDDEN)
    add_vec("emb_b", HIDDEN)
    for l in range(NUM_LAYERS):
        add_vec(f"o_b_{l}", HIDDEN)
        add_vec(f"ln1_g_{l}", HIDDEN)
        add_vec(f"ln1_b_{l}", HIDDEN)
        add_vec(f"ff1_b_{l}", INTERMEDIATE)
        add_vec(f"ff2_b_{l}", HIDDEN)
        add_vec(f"ln2_g_{l}", HIDDEN)
        add_vec(f"ln2_b_{l}", HIDDEN)
    add_vec("pool_b", HIDDEN)
    add_vec("cls_b", CLS_PAD)
    vec_rows = idx
    return mat, mat_rows, vec, vec_rows


_MAT_LAYOUT, _MAT_ROWS, _VEC_LAYOUT, _VEC_ROWS = _build_layouts()
_VEC_ROWS_PAD = ((_VEC_ROWS + 7) // 8) * 8


# ----------------------------- fused Pallas kernel ----------------------------
def _fused_forward_kernel(x_ref, mask_ref, wmat_ref, colb_ref, wvec_ref, out_ref,
                          *, batch, seq, out_rows):
    f32 = jnp.float32
    bf16 = jnp.bfloat16
    T = batch * seq

    def matslab(name):
        r, nr, nc = _MAT_LAYOUT[name]
        return wmat_ref[r:r + nr, 0:nc]

    def vecslab(name):
        i, w = _VEC_LAYOUT[name]
        return wvec_ref[i:i + 1, 0:w]

    def mm(a, b):          # (M,K) @ (K,N)
        return jax.lax.dot_general(a.astype(bf16), b.astype(bf16),
                                   (((1,), (0,)), ((), ())),
                                   preferred_element_type=f32)

    def mm_rt(a, b):       # (M,K) @ (N,K)^T -> (M,N)
        return jax.lax.dot_general(a.astype(bf16), b.astype(bf16),
                                   (((1,), (1,)), ((), ())),
                                   preferred_element_type=f32)

    def layernorm(v, g, b):
        mu = jnp.mean(v, axis=-1, keepdims=True)
        vc = v - mu
        var = jnp.mean(vc * vc, axis=-1, keepdims=True)
        return vc * jax.lax.rsqrt(var + LN_EPS) * g + b

    def gelu(v):
        # TODO(synk): BERT reference uses exact erf-GELU; tanh approx (<1e-3 diff).
        c = f32(np.sqrt(2.0 / np.pi))
        return 0.5 * v * (1.0 + jnp.tanh(c * (v + 0.044715 * v * v * v)))

    x = x_ref[...]                                        # (T, H) f32
    mask = mask_ref[...]                                  # (1, T, T) additive

    # Embedding LayerNorm
    x = layernorm(x, vecslab("emb_g"), vecslab("emb_b"))

    for l in range(NUM_LAYERS):                           # statically unrolled
        # --- Q/K/V: one 2-D matmul each, directly in (H_out, T) layout.
        # Weights stored transposed; softmax scale pre-folded into Q weight+bias.
        qc = mm_rt(matslab(f"wq_t_{l}"), x) + colb_ref[l, 0]   # (H, T)
        kc = mm_rt(matslab(f"wk_t_{l}"), x) + colb_ref[l, 1]   # (H, T)
        vc = mm_rt(matslab(f"wv_t_{l}"), x) + colb_ref[l, 2]   # (H, T)

        q3 = qc.reshape(NUM_HEADS, HEAD_DIM, T)           # leading-split, free
        k3 = kc.reshape(NUM_HEADS, HEAD_DIM, T)
        v3 = vc.reshape(NUM_HEADS, HEAD_DIM, T)
        qt = jnp.swapaxes(q3, 1, 2)                       # (NH, T, Dh), minor-2 xpose

        # --- batched scores over all heads and both sequences at once.
        # Cross-sequence blocks are suppressed by the precomputed additive mask.
        s = jax.lax.dot_general(qt.astype(bf16), k3.astype(bf16),
                                (((2,), (1,)), ((0,), (0,))),
                                preferred_element_type=f32)          # (NH, T, T)
        s = s + mask
        s = s - jnp.max(s, axis=-1, keepdims=True)
        p = jnp.exp(s)
        p = p * pl.reciprocal(jnp.sum(p, axis=-1, keepdims=True), approx=True)

        ctx = jax.lax.dot_general(p.astype(bf16), v3.astype(bf16),
                                  (((2,), (2,)), ((0,), (0,))),
                                  preferred_element_type=f32)        # (NH, T, Dh)

        # --- output projection: batched per-head matmul, summed over heads.
        wo3 = matslab(f"wo_{l}").reshape(NUM_HEADS, HEAD_DIM, HIDDEN)
        attnh = jax.lax.dot_general(ctx.astype(bf16), wo3.astype(bf16),
                                    (((2,), (1,)), ((0,), (0,))),
                                    preferred_element_type=f32)      # (NH, T, H)
        attn = jnp.sum(attnh, axis=0) + vecslab(f"o_b_{l}")          # (T, H)

        x = layernorm(attn + x, vecslab(f"ln1_g_{l}"), vecslab(f"ln1_b_{l}"))

        # --- feed-forward + residual LN
        h1 = gelu(mm(x, matslab(f"ff1_{l}")) + vecslab(f"ff1_b_{l}"))
        h2 = mm(h1, matslab(f"ff2_{l}")) + vecslab(f"ff2_b_{l}")
        x = layernorm(h2 + x, vecslab(f"ln2_g_{l}"), vecslab(f"ln2_b_{l}"))

    # --- pooler (CLS token of each sequence) + classifier, dense (8,128) store.
    cls = x.reshape(batch, seq, HIDDEN)[:, 0, :]                      # (B, H)
    if out_rows > batch:
        cls = jnp.concatenate(
            [cls, jnp.zeros((out_rows - batch, HIDDEN), f32)], axis=0)
    pooled = jnp.tanh(mm(cls, matslab("pool_w")) + vecslab("pool_b"))
    # TODO(synk): nn.Dropout(0.1) is identity at inference; no stochastic path.
    logits = mm(pooled, matslab("cls_w")) + vecslab("cls_b")          # (out_rows, 128)
    out_ref[...] = logits


# ----------------------------- parameter init ---------------------------------
def init_params(key):
    def nrm(k, shape, std=0.02):
        return (std * jax.random.normal(k, shape)).astype(jnp.float32)

    keys = iter(jax.random.split(key, 256))
    p = {
        "word_emb": nrm(next(keys), (VOCAB, HIDDEN)),
        "pos_emb": nrm(next(keys), (MAX_POS, HIDDEN)),
        "type_emb": nrm(next(keys), (TYPE_VOCAB, HIDDEN)),
        "emb_ln_g": jnp.ones((HIDDEN,), jnp.float32),
        "emb_ln_b": jnp.zeros((HIDDEN,), jnp.float32),
        "layers": [],
        "pooler_w": nrm(next(keys), (HIDDEN, HIDDEN)),
        "pooler_b": jnp.zeros((HIDDEN,), jnp.float32),
        "cls_w": nrm(next(keys), (HIDDEN, NUM_CLASSES)),
        "cls_b": jnp.zeros((NUM_CLASSES,), jnp.float32),
    }
    for _ in range(NUM_LAYERS):
        p["layers"].append({
            "q_w": nrm(next(keys), (HIDDEN, HIDDEN)), "q_b": jnp.zeros((HIDDEN,), jnp.float32),
            "k_w": nrm(next(keys), (HIDDEN, HIDDEN)), "k_b": jnp.zeros((HIDDEN,), jnp.float32),
            "v_w": nrm(next(keys), (HIDDEN, HIDDEN)), "v_b": jnp.zeros((HIDDEN,), jnp.float32),
            "o_w": nrm(next(keys), (HIDDEN, HIDDEN)), "o_b": jnp.zeros((HIDDEN,), jnp.float32),
            "ln1_g": jnp.ones((HIDDEN,), jnp.float32), "ln1_b": jnp.zeros((HIDDEN,), jnp.float32),
            "ff1_w": nrm(next(keys), (HIDDEN, INTERMEDIATE)),
            "ff1_b": jnp.zeros((INTERMEDIATE,), jnp.float32),
            "ff2_w": nrm(next(keys), (INTERMEDIATE, HIDDEN)),
            "ff2_b": jnp.zeros((HIDDEN,), jnp.float32),
            "ln2_g": jnp.ones((HIDDEN,), jnp.float32), "ln2_b": jnp.zeros((HIDDEN,), jnp.float32),
        })
    return p


# ------------------- one-time weight packing (outside jit) --------------------
def pack_params(p):
    scale = np.float32(1.0 / np.sqrt(HEAD_DIM))

    wmat = np.zeros((_MAT_ROWS, 128), np.float32)

    def put_mat(name, arr):
        r, nr, nc = _MAT_LAYOUT[name]
        wmat[r:r + nr, :nc] = np.asarray(arr, np.float32)

    for l, lp in enumerate(p["layers"]):
        put_mat(f"wq_t_{l}", np.asarray(lp["q_w"]).T * scale)   # fold softmax scale
        put_mat(f"wk_t_{l}", np.asarray(lp["k_w"]).T)
        put_mat(f"wv_t_{l}", np.asarray(lp["v_w"]).T)
        put_mat(f"wo_{l}", lp["o_w"])
        put_mat(f"ff1_{l}", lp["ff1_w"])
        put_mat(f"ff2_{l}", lp["ff2_w"])
    put_mat("pool_w", p["pooler_w"])
    cls_w_pad = np.zeros((HIDDEN, CLS_PAD), np.float32)
    cls_w_pad[:, :NUM_CLASSES] = np.asarray(p["cls_w"])
    put_mat("cls_w", cls_w_pad)

    wvec = np.zeros((_VEC_ROWS_PAD, 128), np.float32)

    def put_vec(name, arr):
        i, w = _VEC_LAYOUT[name]
        wvec[i, :w] = np.asarray(arr, np.float32)

    put_vec("emb_g", p["emb_ln_g"])
    put_vec("emb_b", p["emb_ln_b"])
    for l, lp in enumerate(p["layers"]):
        put_vec(f"o_b_{l}", lp["o_b"])
        put_vec(f"ln1_g_{l}", lp["ln1_g"])
        put_vec(f"ln1_b_{l}", lp["ln1_b"])
        put_vec(f"ff1_b_{l}", lp["ff1_b"])
        put_vec(f"ff2_b_{l}", lp["ff2_b"])
        put_vec(f"ln2_g_{l}", lp["ln2_g"])
        put_vec(f"ln2_b_{l}", lp["ln2_b"])
    put_vec("pool_b", p["pooler_b"])
    cls_b_pad = np.zeros((CLS_PAD,), np.float32)
    cls_b_pad[:NUM_CLASSES] = np.asarray(p["cls_b"])
    put_vec("cls_b", cls_b_pad)

    # q/k/v biases as broadcastable column vectors (q bias pre-scaled).
    colb = np.zeros((NUM_LAYERS, 3, HIDDEN, 1), np.float32)
    for l, lp in enumerate(p["layers"]):
        colb[l, 0, :, 0] = np.asarray(lp["q_b"]) * scale
        colb[l, 1, :, 0] = np.asarray(lp["k_b"])
        colb[l, 2, :, 0] = np.asarray(lp["v_b"])

    # token_type_ids default to zeros in BertModel -> fold type row 0 into pos.
    pos_type = np.asarray(p["pos_emb"], np.float32) + np.asarray(p["type_emb"])[0][None, :]

    return {
        "word_emb": jnp.asarray(p["word_emb"], jnp.float32),
        "pos_type_emb": jnp.asarray(pos_type, jnp.float32),
        "wmat": jnp.asarray(wmat),
        "wvec": jnp.asarray(wvec),
        "colb": jnp.asarray(colb),
    }


# ----------------------------- forward pass ------------------------------------
def stellar_sentry_forward(packed, input_ids, attention_mask):
    B, S = input_ids.shape
    T = B * S
    out_rows = ((B + 7) // 8) * 8                         # sublane-dense output

    # Embedding gather (data-dependent; plain-JAX glue).
    x = jnp.take(packed["word_emb"], input_ids, axis=0)   # (B, S, H)
    x = x + packed["pos_type_emb"][:S][None, :, :]
    x = x.reshape(T, HIDDEN).astype(jnp.float32)

    # Additive (T, T) mask: key padding within a sequence + block-diagonal
    # suppression of cross-sequence attention (all sequences are batched into
    # one score tensor inside the kernel).
    key_mask = (1.0 - attention_mask.astype(jnp.float32)) * NEG_INF   # (B, S)
    bidx = jnp.repeat(jnp.arange(B), S)                               # (T,)
    mask = jnp.where(bidx[:, None] == bidx[None, :],
                     key_mask.reshape(1, T),
                     jnp.float32(NEG_INF))[None]                      # (1, T, T)

    kernel = functools.partial(_fused_forward_kernel,
                               batch=B, seq=S, out_rows=out_rows)
    vmem = pl.BlockSpec(memory_space=pltpu.MemorySpace.VMEM)

    logits_pad = pl.pallas_call(
        kernel,
        out_shape=jax.ShapeDtypeStruct((out_rows, CLS_PAD), jnp.float32),
        in_specs=[vmem] * 5,
        out_specs=vmem,
    )(x, mask, packed["wmat"], packed["colb"], packed["wvec"])

    return logits_pad[:B, :NUM_CLASSES]


# ----------------------------- main --------------------------------------------
if __name__ == "__main__":
    key = jax.random.PRNGKey(0)
    k_ids, k_params = jax.random.split(key)

    B, S = 2, 8
    input_ids = jax.random.randint(k_ids, (B, S), 0, VOCAB, dtype=jnp.int32)
    attention_mask = jnp.array(
        [[1, 1, 1, 1, 1, 1, 1, 1],
         [1, 1, 1, 1, 1, 1, 0, 0]], dtype=jnp.int32)

    params = init_params(k_params)
    packed = pack_params(params)          # one-time packing, outside jit

    fwd = jax.jit(lambda ids, m: stellar_sentry_forward(packed, ids, m))
    logits = fwd(input_ids, attention_mask)
    jax.block_until_ready(logits)

    assert logits.shape == (B, NUM_CLASSES)
    assert bool(jnp.all(jnp.isfinite(logits)))
    print("KERNEL_OK")
</pallas_src>

<mosaic_0001>
module attributes {stable_mosaic.version = 11 : i64} {
  func.func @_fused_forward_kernel(%arg0: memref<16x32xf32, #tpu.memory_space<vmem>>, %arg1: memref<1x16x16xf32, #tpu.memory_space<vmem>>, %arg2: memref<512x128xf32, #tpu.memory_space<vmem>>, %arg3: memref<2x3x32x1xf32, #tpu.memory_space<vmem>>, %arg4: memref<24x128xf32, #tpu.memory_space<vmem>>, %arg5: memref<8x128xf32, #tpu.memory_space<vmem>>) attributes {dimension_semantics = [], scalar_prefetch = 0 : i64, scratch_operands = 0 : i64, tpu.core_type = #tpu.core_type<tc>} {
    %c0 = arith.constant 0 : index
    %c0_0 = arith.constant 0 : index
    %0 = vector.load %arg0[%c0, %c0_0] : memref<16x32xf32, #tpu.memory_space<vmem>>, vector<16x32xf32>
    %c0_1 = arith.constant 0 : index
    %c0_2 = arith.constant 0 : index
    %c0_3 = arith.constant 0 : index
    %1 = vector.load %arg1[%c0_1, %c0_2, %c0_3] : memref<1x16x16xf32, #tpu.memory_space<vmem>>, vector<1x16x16xf32>
    %c0_4 = arith.constant 0 : index
    %c0_5 = arith.constant 0 : index
    %2 = vector.load %arg4[%c0_4, %c0_5] : memref<24x128xf32, #tpu.memory_space<vmem>>, vector<1x32xf32>
    %c1 = arith.constant 1 : index
    %c0_6 = arith.constant 0 : index
    %3 = vector.load %arg4[%c1, %c0_6] : memref<24x128xf32, #tpu.memory_space<vmem>>, vector<1x32xf32>
    %cst = arith.constant dense<0.000000e+00> : vector<16xf32>
    %4 = vector.multi_reduction <add>, %0, %cst [1] : vector<16x32xf32> to vector<16xf32>
    %5 = vector.shape_cast %4 : vector<16xf32> to vector<16x1xf32>
    %cst_7 = arith.constant 3.200000e+01 : f32
    %6 = vector.broadcast %cst_7 : f32 to vector<16x1xf32>
    %7 = arith.divf %5, %6 : vector<16x1xf32>
    %8 = vector.broadcast %7 : vector<16x1xf32> to vector<16x32xf32>
    %9 = arith.subf %0, %8 : vector<16x32xf32>
    %10 = arith.mulf %9, %9 : vector<16x32xf32>
    %cst_8 = arith.constant dense<0.000000e+00> : vector<16xf32>
    %11 = vector.multi_reduction <add>, %10, %cst_8 [1] : vector<16x32xf32> to vector<16xf32>
    %12 = vector.shape_cast %11 : vector<16xf32> to vector<16x1xf32>
    %cst_9 = arith.constant 3.200000e+01 : f32
    %13 = vector.broadcast %cst_9 : f32 to vector<16x1xf32>
    %14 = arith.divf %12, %13 : vector<16x1xf32>
    %cst_10 = arith.constant 9.99999996E-13 : f32
    %15 = vector.broadcast %cst_10 : f32 to vector<16x1xf32>
    %16 = arith.addf %14, %15 : vector<16x1xf32>
    %17 = math.rsqrt %16 : vector<16x1xf32>
    %18 = vector.broadcast %17 : vector<16x1xf32> to vector<16x32xf32>
    %19 = arith.mulf %9, %18 : vector<16x32xf32>
    %20 = vector.broadcast %2 : vector<1x32xf32> to vector<16x32xf32>
    %21 = arith.mulf %19, %20 : vector<16x32xf32>
    %22 = vector.broadcast %3 : vector<1x32xf32> to vector<16x32xf32>
    %23 = arith.addf %21, %22 : vector<16x32xf32>
    %c0_11 = arith.constant 0 : index
    %c0_12 = arith.constant 0 : index
    %24 = vector.load %arg2[%c0_11, %c0_12] : memref<512x128xf32, #tpu.memory_space<vmem>>, vector<32x32xf32>
    %25 = arith.truncf %24 : vector<32x32xf32> to vector<32x32xbf16>
    %26 = arith.truncf %23 : vector<16x32xf32> to vector<16x32xbf16>
    %cst_13 = arith.constant dense<0.000000e+00> : vector<32x16xf32>
    %27 = tpu.matmul %25, %26, %cst_13 {dimension_numbers = #tpu.dot_dimension_numbers<[1], [1], [0], [0], [0, 0, 1, 0], [], []>} : vector<32x32xbf16>, vector<16x32xbf16>, vector<32x16xf32> -> vector<32x16xf32>
    %c0_14 = arith.constant 0 : index
    %c0_15 = arith.constant 0 : index
    %c0_16 = arith.constant 0 : index
    %c0_17 = arith.constant 0 : index
    %28 = vector.load %arg3[%c0_14, %c0_15, %c0_16, %c0_17] : memref<2x3x32x1xf32, #tpu.memory_space<vmem>>, vector<1x1x32x1xf32>
    %29 = vector.shape_cast %28 : vector<1x1x32x1xf32> to vector<32x1xf32>
    %30 = vector.broadcast %29 : vector<32x1xf32> to vector<32x16xf32>
    %31 = arith.addf %27, %30 : vector<32x16xf32>
    %c32 = arith.constant 32 : index
    %c0_18 = arith.constant 0 : index
    %32 = vector.load %arg2[%c32, %c0_18] : memref<512x128xf32, #tpu.memory_space<vmem>>, vector<32x32xf32>
    %33 = arith.truncf %32 : vector<32x32xf32> to vector<32x32xbf16>
    %34 = arith.truncf %23 : vector<16x32xf32> to vector<16x32xbf16>
    %cst_19 = arith.constant dense<0.000000e+00> : vector<32x16xf32>
    %35 = tpu.matmul %33, %34, %cst_19 {dimension_numbers = #tpu.dot_dimension_numbers<[1], [1], [0], [0], [0, 0, 1, 0], [], []>} : vector<32x32xbf16>, vector<16x32xbf16>, vector<32x16xf32> -> vector<32x16xf32>
    %c0_20 = arith.constant 0 : index
    %c1_21 = arith.constant 1 : index
    %c0_22 = arith.constant 0 : index
    %c0_23 = arith.constant 0 : index
    %36 = vector.load %arg3[%c0_20, %c1_21, %c0_22, %c0_23] : memref<2x3x32x1xf32, #tpu.memory_space<vmem>>, vector<1x1x32x1xf32>
    %37 = vector.shape_cast %36 : vector<1x1x32x1xf32> to vector<32x1xf32>
    %38 = vector.broadcast %37 : vector<32x1xf32> to vector<32x16xf32>
    %39 = arith.addf %35, %38 : vector<32x16xf32>
    %c64 = arith.constant 64 : index
    %c0_24 = arith.constant 0 : index
    %40 = vector.load %arg2[%c64, %c0_24] : memref<512x128xf32, #tpu.memory_space<vmem>>, vector<32x32xf32>
    %41 = arith.truncf %40 : vector<32x32xf32> to vector<32x32xbf16>
    %42 = arith.truncf %23 : vector<16x32xf32> to vector<16x32xbf16>
    %cst_25 = arith.constant dense<0.000000e+00> : vector<32x16xf32>
    %43 = tpu.matmul %41, %42, %cst_25 {dimension_numbers = #tpu.dot_dimension_numbers<[1], [1], [0], [0], [0, 0, 1, 0], [], []>} : vector<32x32xbf16>, vector<16x32xbf16>, vector<32x16xf32> -> vector<32x16xf32>
    %c0_26 = arith.constant 0 : index
    %c2 = arith.constant 2 : index
    %c0_27 = arith.constant 0 : index
    %c0_28 = arith.constant 0 : index
    %44 = vector.load %arg3[%c0_26, %c2, %c0_27, %c0_28] : memref<2x3x32x1xf32, #tpu.memory_space<vmem>>, vector<1x1x32x1xf32>
    %45 = vector.shape_cast %44 : vector<1x1x32x1xf32> to vector<32x1xf32>
    %46 = vector.broadcast %45 : vector<32x1xf32> to vector<32x16xf32>
    %47 = arith.addf %43, %46 : vector<32x16xf32>
    %48 = vector.shape_cast %31 : vector<32x16xf32> to vector<4x8x16xf32>
    %49 = vector.shape_cast %39 : vector<32x16xf32> to vector<4x8x16xf32>
    %50 = vector.shape_cast %47 : vector<32x16xf32> to vector<4x8x16xf32>
    %51 = tpu.transpose %48, [0, 2, 1] : vector<4x8x16xf32> -> vector<4x16x8xf32>
    %52 = arith.truncf %51 : vector<4x16x8xf32> to vector<4x16x8xbf16>
    %53 = arith.truncf %49 : vector<4x8x16xf32> to vector<4x8x16xbf16>
    %cst_29 = arith.constant dense<0.000000e+00> : vector<4x16x16xf32>
    %54 = tpu.matmul %52, %53, %cst_29 {dimension_numbers = #tpu.dot_dimension_numbers<[2], [1], [1], [2], [0, 0, 0, 1, 1, 2], [0], [0]>} : vector<4x16x8xbf16>, vector<4x8x16xbf16>, vector<4x16x16xf32> -> vector<4x16x16xf32>
    %55 = vector.broadcast %1 : vector<1x16x16xf32> to vector<4x16x16xf32>
    %56 = arith.addf %54, %55 : vector<4x16x16xf32>
    %cst_30 = arith.constant dense<0xFF800000> : vector<4x16xf32>
    %57 = vector.multi_reduction <maximumf>, %56, %cst_30 [2] : vector<4x16x16xf32> to vector<4x16xf32>
    %58 = vector.shape_cast %57 : vector<4x16xf32> to vector<4x16x1xf32>
    %59 = vector.broadcast %58 : vector<4x16x1xf32> to vector<4x16x16xf32>
    %60 = arith.subf %56, %59 : vector<4x16x16xf32>
    %61 = math.exp %60 : vector<4x16x16xf32>
    %cst_31 = arith.constant dense<0.000000e+00> : vector<4x16xf32>
    %62 = vector.multi_reduction <add>, %61, %cst_31 [2] : vector<4x16x16xf32> to vector<4x16xf32>
    %63 = vector.shape_cast %62 : vector<4x16xf32> to vector<4x16x1xf32>
    %64 = tpu.reciprocal %63 {approx = true} : vector<4x16x1xf32> -> vector<4x16x1xf32>
    %65 = vector.broadcast %64 : vector<4x16x1xf32> to vector<4x16x16xf32>
    %66 = arith.mulf %61, %65 : vector<4x16x16xf32>
    %67 = arith.truncf %66 : vector<4x16x16xf32> to vector<4x16x16xbf16>
    %68 = arith.truncf %50 : vector<4x8x16xf32> to vector<4x8x16xbf16>
    %cst_32 = arith.constant dense<0.000000e+00> : vector<4x16x8xf32>
    %69 = tpu.matmul %67, %68, %cst_32 {dimension_numbers = #tpu.dot_dimension_numbers<[2], [2], [1], [1], [0, 0, 0, 1, 1, 1], [0], [0]>} : vector<4x16x16xbf16>, vector<4x8x16xbf16>, vector<4x16x8xf32> -> vector<4x16x8xf32>
    %c96 = arith.constant 96 : index
    %c0_33 = arith.constant 0 : index
    %70 = vector.load %arg2[%c96, %c0_33] : memref<512x128xf32, #tpu.memory_space<vmem>>, vector<32x32xf32>
    %71 = vector.shape_cast %70 : vector<32x32xf32> to vector<4x8x32xf32>
    %72 = arith.truncf %69 : vector<4x16x8xf32> to vector<4x16x8xbf16>
    %73 = arith.truncf %71 : vector<4x8x32xf32> to vector<4x8x32xbf16>
    %cst_34 = arith.constant dense<0.000000e+00> : vector<4x16x32xf32>
    %74 = tpu.matmul %72, %73, %cst_34 {dimension_numbers = #tpu.dot_dimension_numbers<[2], [1], [1], [2], [0, 0, 0, 1, 1, 2], [0], [0]>} : vector<4x16x8xbf16>, vector<4x8x32xbf16>, vector<4x16x32xf32> -> vector<4x16x32xf32>
    %cst_35 = arith.constant dense<0.000000e+00> : vector<16x32xf32>
    %75 = vector.multi_reduction <add>, %74, %cst_35 [0] : vector<4x16x32xf32> to vector<16x32xf32>
    %c2_36 = arith.constant 2 : index
    %c0_37 = arith.constant 0 : index
    %76 = vector.load %arg4[%c2_36, %c0_37] : memref<24x128xf32, #tpu.memory_space<vmem>>, vector<1x32xf32>
    %77 = vector.broadcast %76 : vector<1x32xf32> to vector<16x32xf32>
    %78 = arith.addf %75, %77 : vector<16x32xf32>
    %79 = arith.addf %78, %23 : vector<16x32xf32>
    %c3 = arith.constant 3 : index
    %c0_38 = arith.constant 0 : index
    %80 = vector.load %arg4[%c3, %c0_38] : memref<24x128xf32, #tpu.memory_space<vmem>>, vector<1x32xf32>
    %c4 = arith.constant 4 : index
    %c0_39 = arith.constant 0 : index
    %81 = vector.load %arg4[%c4, %c0_39] : memref<24x128xf32, #tpu.memory_space<vmem>>, vector<1x32xf32>
    %cst_40 = arith.constant dense<0.000000e+00> : vector<16xf32>
    %82 = vector.multi_reduction <add>, %79, %cst_40 [1] : vector<16x32xf32> to vector<16xf32>
    %83 = vector.shape_cast %82 : vector<16xf32> to vector<16x1xf32>
    %cst_41 = arith.constant 3.200000e+01 : f32
    %84 = vector.broadcast %cst_41 : f32 to vector<16x1xf32>
    %85 = arith.divf %83, %84 : vector<16x1xf32>
    %86 = vector.broadcast %85 : vector<16x1xf32> to vector<16x32xf32>
    %87 = arith.subf %79, %86 : vector<16x32xf32>
    %88 = arith.mulf %87, %87 : vector<16x32xf32>
    %cst_42 = arith.constant dense<0.000000e+00> : vector<16xf32>
    %89 = vector.multi_reduction <add>, %88, %cst_42 [1] : vector<16x32xf32> to vector<16xf32>
    %90 = vector.shape_cast %89 : vector<16xf32> to vector<16x1xf32>
    %cst_43 = arith.constant 3.200000e+01 : f32
    %91 = vector.broadcast %cst_43 : f32 to vector<16x1xf32>
    %92 = arith.divf %90, %91 : vector<16x1xf32>
    %cst_44 = arith.constant 9.99999996E-13 : f32
    %93 = vector.broadcast %cst_44 : f32 to vector<16x1xf32>
    %94 = arith.addf %92, %93 : vector<16x1xf32>
    %95 = math.rsqrt %94 : vector<16x1xf32>
    %96 = vector.broadcast %95 : vector<16x1xf32> to vector<16x32xf32>
    %97 = arith.mulf %87, %96 : vector<16x32xf32>
    %98 = vector.broadcast %80 : vector<1x32xf32> to vector<16x32xf32>
    %99 = arith.mulf %97, %98 : vector<16x32xf32>
    %100 = vector.broadcast %81 : vector<1x32xf32> to vector<16x32xf32>
    %101 = arith.addf %99, %100 : vector<16x32xf32>
    %c128 = arith.constant 128 : index
    %c0_45 = arith.constant 0 : index
    %102 = vector.load %arg2[%c128, %c0_45] : memref<512x128xf32, #tpu.memory_space<vmem>>, vector<32x64xf32>
    %103 = arith.truncf %101 : vector<16x32xf32> to vector<16x32xbf16>
    %104 = arith.truncf %102 : vector<32x64xf32> to vector<32x64xbf16>
    %cst_46 = arith.constant dense<0.000000e+00> : vector<16x64xf32>
    %105 = tpu.matmul %103, %104, %cst_46 {dimension_numbers = #tpu.dot_dimension_numbers<[1], [0], [0], [1], [0, 0, 1, 1], [], []>} : vector<16x32xbf16>, vector<32x64xbf16>, vector<16x64xf32> -> vector<16x64xf32>
    %c5 = arith.constant 5 : index
    %c0_47 = arith.constant 0 : index
    %106 = vector.load %arg4[%c5, %c0_47] : memref<24x128xf32, #tpu.memory_space<vmem>>, vector<1x64xf32>
    %107 = vector.broadcast %106 : vector<1x64xf32> to vector<16x64xf32>
    %108 = arith.addf %105, %107 : vector<16x64xf32>
    %cst_48 = arith.constant 5.000000e-01 : f32
    %109 = vector.broadcast %cst_48 : f32 to vector<16x64xf32>
    %110 = arith.mulf %109, %108 : vector<16x64xf32>
    %cst_49 = arith.constant 4.471500e-02 : f32
    %111 = vector.broadcast %cst_49 : f32 to vector<16x64xf32>
    %112 = arith.mulf %111, %108 : vector<16x64xf32>
    %113 = arith.mulf %112, %108 : vector<16x64xf32>
    %114 = arith.mulf %113, %108 : vector<16x64xf32>
    %115 = arith.addf %108, %114 : vector<16x64xf32>
    %cst_50 = arith.constant 0.797884583 : f32
    %116 = vector.broadcast %cst_50 : f32 to vector<16x64xf32>
    %117 = arith.mulf %116, %115 : vector<16x64xf32>
    %118 = math.tanh %117 : vector<16x64xf32>
    %cst_51 = arith.constant 1.000000e+00 : f32
    %119 = vector.broadcast %cst_51 : f32 to vector<16x64xf32>
    %120 = arith.addf %119, %118 : vector<16x64xf32>
    %121 = arith.mulf %110, %120 : vector<16x64xf32>
    %c160 = arith.constant 160 : index
    %c0_52 = arith.constant 0 : index
    %122 = vector.load %arg2[%c160, %c0_52] : memref<512x128xf32, #tpu.memory_space<vmem>>, vector<64x32xf32>
    %123 = arith.truncf %121 : vector<16x64xf32> to vector<16x64xbf16>
    %124 = arith.truncf %122 : vector<64x32xf32> to vector<64x32xbf16>
    %cst_53 = arith.constant dense<0.000000e+00> : vector<16x32xf32>
    %125 = tpu.matmul %123, %124, %cst_53 {dimension_numbers = #tpu.dot_dimension_numbers<[1], [0], [0], [1], [0, 0, 1, 1], [], []>} : vector<16x64xbf16>, vector<64x32xbf16>, vector<16x32xf32> -> vector<16x32xf32>
    %c6 = arith.constant 6 : index
    %c0_54 = arith.constant 0 : index
    %126 = vector.load %arg4[%c6, %c0_54] : memref<24x128xf32, #tpu.memory_space<vmem>>, vector<1x32xf32>
    %127 = vector.broadcast %126 : vector<1x32xf32> to vector<16x32xf32>
    %128 = arith.addf %125, %127 : vector<16x32xf32>
    %129 = arith.addf %128, %101 : vector<16x32xf32>
    %c7 = arith.constant 7 : index
    %c0_55 = arith.constant 0 : index
    %130 = vector.load %arg4[%c7, %c0_55] : memref<24x128xf32, #tpu.memory_space<vmem>>, vector<1x32xf32>
    %c8 = arith.constant 8 : index
    %c0_56 = arith.constant 0 : index
    %131 = vector.load %arg4[%c8, %c0_56] : memref<24x128xf32, #tpu.memory_space<vmem>>, vector<1x32xf32>
    %cst_57 = arith.constant dense<0.000000e+00> : vector<16xf32>
    %132 = vector.multi_reduction <add>, %129, %cst_57 [1] : vector<16x32xf32> to vector<16xf32>
    %133 = vector.shape_cast %132 : vector<16xf32> to vector<16x1xf32>
    %cst_58 = arith.constant 3.200000e+01 : f32
    %134 = vector.broadcast %cst_58 : f32 to vector<16x1xf32>
    %135 = arith.divf %133, %134 : vector<16x1xf32>
    %136 = vector.broadcast %135 : vector<16x1xf32> to vector<16x32xf32>
    %137 = arith.subf %129, %136 : vector<16x32xf32>
    %138 = arith.mulf %137, %137 : vector<16x32xf32>
    %cst_59 = arith.constant dense<0.000000e+00> : vector<16xf32>
    %139 = vector.multi_reduction <add>, %138, %cst_59 [1] : vector<16x32xf32> to vector<16xf32>
    %140 = vector.shape_cast %139 : vector<16xf32> to vector<16x1xf32>
    %cst_60 = arith.constant 3.200000e+01 : f32
    %141 = vector.broadcast %cst_60 : f32 to vector<16x1xf32>
    %142 = arith.divf %140, %141 : vector<16x1xf32>
    %cst_61 = arith.constant 9.99999996E-13 : f32
    %143 = vector.broadcast %cst_61 : f32 to vector<16x1xf32>
    %144 = arith.addf %142, %143 : vector<16x1xf32>
    %145 = math.rsqrt %144 : vector<16x1xf32>
    %146 = vector.broadcast %145 : vector<16x1xf32> to vector<16x32xf32>
    %147 = arith.mulf %137, %146 : vector<16x32xf32>
    %148 = vector.broadcast %130 : vector<1x32xf32> to vector<16x32xf32>
    %149 = arith.mulf %147, %148 : vector<16x32xf32>
    %150 = vector.broadcast %131 : vector<1x32xf32> to vector<16x32xf32>
    %151 = arith.addf %149, %150 : vector<16x32xf32>
    %c224 = arith.constant 224 : index
    %c0_62 = arith.constant 0 : index
    %152 = vector.load %arg2[%c224, %c0_62] : memref<512x128xf32, #tpu.memory_space<vmem>>, vector<32x32xf32>
    %153 = arith.truncf %152 : vector<32x32xf32> to vector<32x32xbf16>
    %154 = arith.truncf %151 : vector<16x32xf32> to vector<16x32xbf16>
    %cst_63 = arith.constant dense<0.000000e+00> : vector<32x16xf32>
    %155 = tpu.matmul %153, %154, %cst_63 {dimension_numbers = #tpu.dot_dimension_numbers<[1], [1], [0], [0], [0, 0, 1, 0], [], []>} : vector<32x32xbf16>, vector<16x32xbf16>, vector<32x16xf32> -> vector<32x16xf32>
    %c1_64 = arith.constant 1 : index
    %c0_65 = arith.constant 0 : index
    %c0_66 = arith.constant 0 : index
    %c0_67 = arith.constant 0 : index
    %156 = vector.load %arg3[%c1_64, %c0_65, %c0_66, %c0_67] : memref<2x3x32x1xf32, #tpu.memory_space<vmem>>, vector<1x1x32x1xf32>
    %157 = vector.shape_cast %156 : vector<1x1x32x1xf32> to vector<32x1xf32>
    %158 = vector.broadcast %157 : vector<32x1xf32> to vector<32x16xf32>
    %159 = arith.addf %155, %158 : vector<32x16xf32>
    %c256 = arith.constant 256 : index
    %c0_68 = arith.constant 0 : index
    %160 = vector.load %arg2[%c256, %c0_68] : memref<512x128xf32, #tpu.memory_space<vmem>>, vector<32x32xf32>
    %161 = arith.truncf %160 : vector<32x32xf32> to vector<32x32xbf16>
    %162 = arith.truncf %151 : vector<16x32xf32> to vector<16x32xbf16>
    %cst_69 = arith.constant dense<0.000000e+00> : vector<32x16xf32>
    %163 = tpu.matmul %161, %162, %cst_69 {dimension_numbers = #tpu.dot_dimension_numbers<[1], [1], [0], [0], [0, 0, 1, 0], [], []>} : vector<32x32xbf16>, vector<16x32xbf16>, vector<32x16xf32> -> vector<32x16xf32>
    %c1_70 = arith.constant 1 : index
    %c1_71 = arith.constant 1 : index
    %c0_72 = arith.constant 0 : index
    %c0_73 = arith.constant 0 : index
    %164 = vector.load %arg3[%c1_70, %c1_71, %c0_72, %c0_73] : memref<2x3x32x1xf32, #tpu.memory_space<vmem>>, vector<1x1x32x1xf32>
    %165 = vector.shape_cast %164 : vector<1x1x32x1xf32> to vector<32x1xf32>
    %166 = vector.broadcast %165 : vector<32x1xf32> to vector<32x16xf32>
    %167 = arith.addf %163, %166 : vector<32x16xf32>
    %c288 = arith.constant 288 : index
    %c0_74 = arith.constant 0 : index
    %168 = vector.load %arg2[%c288, %c0_74] : memref<512x128xf32, #tpu.memory_space<vmem>>, vector<32x32xf32>
    %169 = arith.truncf %168 : vector<32x32xf32> to vector<32x32xbf16>
    %170 = arith.truncf %151 : vector<16x32xf32> to vector<16x32xbf16>
    %cst_75 = arith.constant dense<0.000000e+00> : vector<32x16xf32>
    %171 = tpu.matmul %169, %170, %cst_75 {dimension_numbers = #tpu.dot_dimension_numbers<[1], [1], [0], [0], [0, 0, 1, 0], [], []>} : vector<32x32xbf16>, vector<16x32xbf16>, vector<32x16xf32> -> vector<32x16xf32>
    %c1_76 = arith.constant 1 : index
    %c2_77 = arith.constant 2 : index
    %c0_78 = arith.constant 0 : index
    %c0_79 = arith.constant 0 : index
    %172 = vector.load %arg3[%c1_76, %c2_77, %c0_78, %c0_79] : memref<2x3x32x1xf32, #tpu.memory_space<vmem>>, vector<1x1x32x1xf32>
    %173 = vector.shape_cast %172 : vector<1x1x32x1xf32> to vector<32x1xf32>
    %174 = vector.broadcast %173 : vector<32x1xf32> to vector<32x16xf32>
    %175 = arith.addf %171, %174 : vector<32x16xf32>
    %176 = vector.shape_cast %159 : vector<32x16xf32> to vector<4x8x16xf32>
    %177 = vector.shape_cast %167 : vector<32x16xf32> to vector<4x8x16xf32>
    %178 = vector.shape_cast %175 : vector<32x16xf32> to vector<4x8x16xf32>
    %179 = tpu.transpose %176, [0, 2, 1] : vector<4x8x16xf32> -> vector<4x16x8xf32>
    %180 = arith.truncf %179 : vector<4x16x8xf32> to vector<4x16x8xbf16>
    %181 = arith.truncf %177 : vector<4x8x16xf32> to vector<4x8x16xbf16>
    %cst_80 = arith.constant dense<0.000000e+00> : vector<4x16x16xf32>
    %182 = tpu.matmul %180, %181, %cst_80 {dimension_numbers = #tpu.dot_dimension_numbers<[2], [1], [1], [2], [0, 0, 0, 1, 1, 2], [0], [0]>} : vector<4x16x8xbf16>, vector<4x8x16xbf16>, vector<4x16x16xf32> -> vector<4x16x16xf32>
    %183 = vector.broadcast %1 : vector<1x16x16xf32> to vector<4x16x16xf32>
    %184 = arith.addf %182, %183 : vector<4x16x16xf32>
    %cst_81 = arith.constant dense<0xFF800000> : vector<4x16xf32>
    %185 = vector.multi_reduction <maximumf>, %184, %cst_81 [2] : vector<4x16x16xf32> to vector<4x16xf32>
    %186 = vector.shape_cast %185 : vector<4x16xf32> to vector<4x16x1xf32>
    %187 = vector.broadcast %186 : vector<4x16x1xf32> to vector<4x16x16xf32>
    %188 = arith.subf %184, %187 : vector<4x16x16xf32>
    %189 = math.exp %188 : vector<4x16x16xf32>
    %cst_82 = arith.constant dense<0.000000e+00> : vector<4x16xf32>
    %190 = vector.multi_reduction <add>, %189, %cst_82 [2] : vector<4x16x16xf32> to vector<4x16xf32>
    %191 = vector.shape_cast %190 : vector<4x16xf32> to vector<4x16x1xf32>
    %192 = tpu.reciprocal %191 {approx = true} : vector<4x16x1xf32> -> vector<4x16x1xf32>
    %193 = vector.broadcast %192 : vector<4x16x1xf32> to vector<4x16x16xf32>
    %194 = arith.mulf %189, %193 : vector<4x16x16xf32>
    %195 = arith.truncf %194 : vector<4x16x16xf32> to vector<4x16x16xbf16>
    %196 = arith.truncf %178 : vector<4x8x16xf32> to vector<4x8x16xbf16>
    %cst_83 = arith.constant dense<0.000000e+00> : vector<4x16x8xf32>
    %197 = tpu.matmul %195, %196, %cst_83 {dimension_numbers = #tpu.dot_dimension_numbers<[2], [2], [1], [1], [0, 0, 0, 1, 1, 1], [0], [0]>} : vector<4x16x16xbf16>, vector<4x8x16xbf16>, vector<4x16x8xf32> -> vector<4x16x8xf32>
    %c320 = arith.constant 320 : index
    %c0_84 = arith.constant 0 : index
    %198 = vector.load %arg2[%c320, %c0_84] : memref<512x128xf32, #tpu.memory_space<vmem>>, vector<32x32xf32>
    %199 = vector.shape_cast %198 : vector<32x32xf32> to vector<4x8x32xf32>
    %200 = arith.truncf %197 : vector<4x16x8xf32> to vector<4x16x8xbf16>
    %201 = arith.truncf %199 : vector<4x8x32xf32> to vector<4x8x32xbf16>
    %cst_85 = arith.constant dense<0.000000e+00> : vector<4x16x32xf32>
    %202 = tpu.matmul %200, %201, %cst_85 {dimension_numbers = #tpu.dot_dimension_numbers<[2], [1], [1], [2], [0, 0, 0, 1, 1, 2], [0], [0]>} : vector<4x16x8xbf16>, vector<4x8x32xbf16>, vector<4x16x32xf32> -> vector<4x16x32xf32>
    %cst_86 = arith.constant dense<0.000000e+00> : vector<16x32xf32>
    %203 = vector.multi_reduction <add>, %202, %cst_86 [0] : vector<4x16x32xf32> to vector<16x32xf32>
    %c9 = arith.constant 9 : index
    %c0_87 = arith.constant 0 : index
    %204 = vector.load %arg4[%c9, %c0_87] : memref<24x128xf32, #tpu.memory_space<vmem>>, vector<1x32xf32>
    %205 = vector.broadcast %204 : vector<1x32xf32> to vector<16x32xf32>
    %206 = arith.addf %203, %205 : vector<16x32xf32>
    %207 = arith.addf %206, %151 : vector<16x32xf32>
    %c10 = arith.constant 10 : index
    %c0_88 = arith.constant 0 : index
    %208 = vector.load %arg4[%c10, %c0_88] : memref<24x128xf32, #tpu.memory_space<vmem>>, vector<1x32xf32>
    %c11 = arith.constant 11 : index
    %c0_89 = arith.constant 0 : index
    %209 = vector.load %arg4[%c11, %c0_89] : memref<24x128xf32, #tpu.memory_space<vmem>>, vector<1x32xf32>
    %cst_90 = arith.constant dense<0.000000e+00> : vector<16xf32>
    %210 = vector.multi_reduction <add>, %207, %cst_90 [1] : vector<16x32xf32> to vector<16xf32>
    %211 = vector.shape_cast %210 : vector<16xf32> to vector<16x1xf32>
    %cst_91 = arith.constant 3.200000e+01 : f32
    %212 = vector.broadcast %cst_91 : f32 to vector<16x1xf32>
    %213 = arith.divf %211, %212 : vector<16x1xf32>
    %214 = vector.broadcast %213 : vector<16x1xf32> to vector<16x32xf32>
    %215 = arith.subf %207, %214 : vector<16x32xf32>
    %216 = arith.mulf %215, %215 : vector<16x32xf32>
    %cst_92 = arith.constant dense<0.000000e+00> : vector<16xf32>
    %217 = vector.multi_reduction <add>, %216, %cst_92 [1] : vector<16x32xf32> to vector<16xf32>
    %218 = vector.shape_cast %217 : vector<16xf32> to vector<16x1xf32>
    %cst_93 = arith.constant 3.200000e+01 : f32
    %219 = vector.broadcast %cst_93 : f32 to vector<16x1xf32>
    %220 = arith.divf %218, %219 : vector<16x1xf32>
    %cst_94 = arith.constant 9.99999996E-13 : f32
    %221 = vector.broadcast %cst_94 : f32 to vector<16x1xf32>
    %222 = arith.addf %220, %221 : vector<16x1xf32>
    %223 = math.rsqrt %222 : vector<16x1xf32>
    %224 = vector.broadcast %223 : vector<16x1xf32> to vector<16x32xf32>
    %225 = arith.mulf %215, %224 : vector<16x32xf32>
    %226 = vector.broadcast %208 : vector<1x32xf32> to vector<16x32xf32>
    %227 = arith.mulf %225, %226 : vector<16x32xf32>
    %228 = vector.broadcast %209 : vector<1x32xf32> to vector<16x32xf32>
    %229 = arith.addf %227, %228 : vector<16x32xf32>
    %c352 = arith.constant 352 : index
    %c0_95 = arith.constant 0 : index
    %230 = vector.load %arg2[%c352, %c0_95] : memref<512x128xf32, #tpu.memory_space<vmem>>, vector<32x64xf32>
    %231 = arith.truncf %229 : vector<16x32xf32> to vector<16x32xbf16>
    %232 = arith.truncf %230 : vector<32x64xf32> to vector<32x64xbf16>
    %cst_96 = arith.constant dense<0.000000e+00> : vector<16x64xf32>
    %233 = tpu.matmul %231, %232, %cst_96 {dimension_numbers = #tpu.dot_dimension_numbers<[1], [0], [0], [1], [0, 0, 1, 1], [], []>} : vector<16x32xbf16>, vector<32x64xbf16>, vector<16x64xf32> -> vector<16x64xf32>
    %c12 = arith.constant 12 : index
    %c0_97 = arith.constant 0 : index
    %234 = vector.load %arg4[%c12, %c0_97] : memref<24x128xf32, #tpu.memory_space<vmem>>, vector<1x64xf32>
    %235 = vector.broadcast %234 : vector<1x64xf32> to vector<16x64xf32>
    %236 = arith.addf %233, %235 : vector<16x64xf32>
    %cst_98 = arith.constant 5.000000e-01 : f32
    %237 = vector.broadcast %cst_98 : f32 to vector<16x64xf32>
    %238 = arith.mulf %237, %236 : vector<16x64xf32>
    %cst_99 = arith.constant 4.471500e-02 : f32
    %239 = vector.broadcast %cst_99 : f32 to vector<16x64xf32>
    %240 = arith.mulf %239, %236 : vector<16x64xf32>
    %241 = arith.mulf %240, %236 : vector<16x64xf32>
    %242 = arith.mulf %241, %236 : vector<16x64xf32>
    %243 = arith.addf %236, %242 : vector<16x64xf32>
    %cst_100 = arith.constant 0.797884583 : f32
    %244 = vector.broadcast %cst_100 : f32 to vector<16x64xf32>
    %245 = arith.mulf %244, %243 : vector<16x64xf32>
    %246 = math.tanh %245 : vector<16x64xf32>
    %cst_101 = arith.constant 1.000000e+00 : f32
    %247 = vector.broadcast %cst_101 : f32 to vector<16x64xf32>
    %248 = arith.addf %247, %246 : vector<16x64xf32>
    %249 = arith.mulf %238, %248 : vector<16x64xf32>
    %c384 = arith.constant 384 : index
    %c0_102 = arith.constant 0 : index
    %250 = vector.load %arg2[%c384, %c0_102] : memref<512x128xf32, #tpu.memory_space<vmem>>, vector<64x32xf32>
    %251 = arith.truncf %249 : vector<16x64xf32> to vector<16x64xbf16>
    %252 = arith.truncf %250 : vector<64x32xf32> to vector<64x32xbf16>
    %cst_103 = arith.constant dense<0.000000e+00> : vector<16x32xf32>
    %253 = tpu.matmul %251, %252, %cst_103 {dimension_numbers = #tpu.dot_dimension_numbers<[1], [0], [0], [1], [0, 0, 1, 1], [], []>} : vector<16x64xbf16>, vector<64x32xbf16>, vector<16x32xf32> -> vector<16x32xf32>
    %c13 = arith.constant 13 : index
    %c0_104 = arith.constant 0 : index
    %254 = vector.load %arg4[%c13, %c0_104] : memref<24x128xf32, #tpu.memory_space<vmem>>, vector<1x32xf32>
    %255 = vector.broadcast %254 : vector<1x32xf32> to vector<16x32xf32>
    %256 = arith.addf %253, %255 : vector<16x32xf32>
    %257 = arith.addf %256, %229 : vector<16x32xf32>
    %c14 = arith.constant 14 : index
    %c0_105 = arith.constant 0 : index
    %258 = vector.load %arg4[%c14, %c0_105] : memref<24x128xf32, #tpu.memory_space<vmem>>, vector<1x32xf32>
    %c15 = arith.constant 15 : index
    %c0_106 = arith.constant 0 : index
    %259 = vector.load %arg4[%c15, %c0_106] : memref<24x128xf32, #tpu.memory_space<vmem>>, vector<1x32xf32>
    %cst_107 = arith.constant dense<0.000000e+00> : vector<16xf32>
    %260 = vector.multi_reduction <add>, %257, %cst_107 [1] : vector<16x32xf32> to vector<16xf32>
    %261 = vector.shape_cast %260 : vector<16xf32> to vector<16x1xf32>
    %cst_108 = arith.constant 3.200000e+01 : f32
    %262 = vector.broadcast %cst_108 : f32 to vector<16x1xf32>
    %263 = arith.divf %261, %262 : vector<16x1xf32>
    %264 = vector.broadcast %263 : vector<16x1xf32> to vector<16x32xf32>
    %265 = arith.subf %257, %264 : vector<16x32xf32>
    %266 = arith.mulf %265, %265 : vector<16x32xf32>
    %cst_109 = arith.constant dense<0.000000e+00> : vector<16xf32>
    %267 = vector.multi_reduction <add>, %266, %cst_109 [1] : vector<16x32xf32> to vector<16xf32>
    %268 = vector.shape_cast %267 : vector<16xf32> to vector<16x1xf32>
    %cst_110 = arith.constant 3.200000e+01 : f32
    %269 = vector.broadcast %cst_110 : f32 to vector<16x1xf32>
    %270 = arith.divf %268, %269 : vector<16x1xf32>
    %cst_111 = arith.constant 9.99999996E-13 : f32
    %271 = vector.broadcast %cst_111 : f32 to vector<16x1xf32>
    %272 = arith.addf %270, %271 : vector<16x1xf32>
    %273 = math.rsqrt %272 : vector<16x1xf32>
    %274 = vector.broadcast %273 : vector<16x1xf32> to vector<16x32xf32>
    %275 = arith.mulf %265, %274 : vector<16x32xf32>
    %276 = vector.broadcast %258 : vector<1x32xf32> to vector<16x32xf32>
    %277 = arith.mulf %275, %276 : vector<16x32xf32>
    %278 = vector.broadcast %259 : vector<1x32xf32> to vector<16x32xf32>
    %279 = arith.addf %277, %278 : vector<16x32xf32>
    %280 = vector.shape_cast %279 : vector<16x32xf32> to vector<2x8x32xf32>
    %281 = vector.extract_strided_slice %280 {offsets = [0, 0, 0], sizes = [2, 1, 32], strides = [1, 1, 1]} : vector<2x8x32xf32> to vector<2x1x32xf32>
    %282 = vector.shape_cast %281 : vector<2x1x32xf32> to vector<2x32xf32>
    %cst_112 = arith.constant 0.000000e+00 : f32
    %283 = vector.broadcast %cst_112 : f32 to vector<6x32xf32>
    %284 = tpu.concatenate %282, %283 in 0 : vector<2x32xf32>, vector<6x32xf32> -> vector<8x32xf32>
    %c448 = arith.constant 448 : index
    %c0_113 = arith.constant 0 : index
    %285 = vector.load %arg2[%c448, %c0_113] : memref<512x128xf32, #tpu.memory_space<vmem>>, vector<32x32xf32>
    %286 = arith.truncf %284 : vector<8x32xf32> to vector<8x32xbf16>
    %287 = arith.truncf %285 : vector<32x32xf32> to vector<32x32xbf16>
    %cst_114 = arith.constant dense<0.000000e+00> : vector<8x32xf32>
    %288 = tpu.matmul %286, %287, %cst_114 {dimension_numbers = #tpu.dot_dimension_numbers<[1], [0], [0], [1], [0, 0, 1, 1], [], []>} : vector<8x32xbf16>, vector<32x32xbf16>, vector<8x32xf32> -> vector<8x32xf32>
    %c16 = arith.constant 16 : index
    %c0_115 = arith.constant 0 : index
    %289 = vector.load %arg4[%c16, %c0_115] : memref<24x128xf32, #tpu.memory_space<vmem>>, vector<1x32xf32>
    %290 = vector.broadcast %289 : vector<1x32xf32> to vector<8x32xf32>
    %291 = arith.addf %288, %290 : vector<8x32xf32>
    %292 = math.tanh %291 : vector<8x32xf32>
    %c480 = arith.constant 480 : index
    %c0_116 = arith.constant 0 : index
    %293 = vector.load %arg2[%c480, %c0_116] : memref<512x128xf32, #tpu.memory_space<vmem>>, vector<32x128xf32>
    %294 = arith.truncf %292 : vector<8x32xf32> to vector<8x32xbf16>
    %295 = arith.truncf %293 : vector<32x128xf32> to vector<32x128xbf16>
    %cst_117 = arith.constant dense<0.000000e+00> : vector<8x128xf32>
    %296 = tpu.matmul %294, %295, %cst_117 {dimension_numbers = #tpu.dot_dimension_numbers<[1], [0], [0], [1], [0, 0, 1, 1], [], []>} : vector<8x32xbf16>, vector<32x128xbf16>, vector<8x128xf32> -> vector<8x128xf32>
    %c17 = arith.constant 17 : index
    %c0_118 = arith.constant 0 : index
    %297 = vector.load %arg4[%c17, %c0_118] : memref<24x128xf32, #tpu.memory_space<vmem>>, vector<1x128xf32>
    %298 = vector.broadcast %297 : vector<1x128xf32> to vector<8x128xf32>
    %299 = arith.addf %296, %298 : vector<8x128xf32>
    %c0_119 = arith.constant 0 : index
    %c0_120 = arith.constant 0 : index
    %300 = vector.load %arg5[%c0_119, %c0_120] : memref<8x128xf32, #tpu.memory_space<vmem>>, vector<8x128xf32>
    tpu.vector_store %arg5[%c0_119, %c0_120], %299 {strides = array<i32>} : memref<8x128xf32, #tpu.memory_space<vmem>>, vector<8x128xf32>,
    return
  }
}

</mosaic_0001>

<bundles_post_ra>
// kernel: _lambda_.1
= control target key start
LH: loop header
LB: loop body
LE: loop exit
PB: predicated region body
PF: predicated region fallthrough
CT: control target
= control target key end

     0   :  { %10 = vsyncpa [#allocation3], 0  ;;  %s3417_s18 = smov [#allocation2]   ;;  %s3926_s0 = inlined_call_operand.vmem [shape: f32[16,32], index: 0, kind: input, shape index: {}]   ;;  %s3927_s1 = inlined_call_operand.vmem [shape: f32[1,16,16], index: 1, kind: input, shape index: {}]   ;;  %s3928_s2 = inlined_call_operand.hbm [shape: f32[512,128], index: 2, kind: input, shape index: {}]   ;;  %s3929_s3 = inlined_call_operand.vmem [shape: f32[2,3,32,1], index: 3, kind: input, shape index: {}]   ;;  %s3930_s4 = inlined_call_operand.vmem [shape: f32[24,128], index: 4, kind: input, shape index: {}]   ;;  %s3931_s5 = inlined_call_operand.vmem [shape: f32[8,128], index: 5, kind: output, shape index: {}]  }
   0x1   :  { %s20_s19 = sshll.u32 %s3417_s18, 4  ;;  %s3393_s22 = scalar_lea.hbm %s3928_s2, 8192  ;;  %s21_s19 = int_to_ptr.vmem [resolvable:$true] %s20_s19 }
   0x2   :  { %p3394_p0 = scmp.ne.s32.totalorder %s3928_s2, %s3393_s22  ;;  %p3397_p1 = scmp.lt.u32.totalorder %s3393_s22, %s3928_s2 }
   0x4   :  { %p3399_p2 = pnand %p3397_p1, %p3394_p0 }
   0x6   :  { %3402 = shalt.err (!%p3399_p2)
}
   0x7   :  { %s3403_s27 = scalar_lea.vmem %s21_s19, 8192  ;;  %p3408_p4 = scmp.lt.s32.totalorder %s21_s19, %s21_s19 }
   0x8   :  { %p3404_p3 = scmp.ne.s32.totalorder %s21_s19, %s3403_s27  ;;  %p3409_p5 = scmp.lt.s32.totalorder %s3403_s27, %s3403_s27 }
   0xa   :  { %p3410_p6 = por %p3409_p5, %p3408_p4 }
   0xc   :  { %p3411_p7 = pnand %p3410_p6, %p3404_p3 }
   0xe   :  { %3414 = shalt.err (!%p3411_p7)
}
   0xf   :  { %s3418_s28 = smov 128   ;;  %s3419_s29 = smov 8  }
  0x10   :  { %26 = dma.hbm_to_vmem [thread:$0]  %s3928_s2, 8192, %s21_s19, [#allocation3], %s3418_s28, %s3418_s28, %s3419_s29  }
  0x11   :  { %3415 = dma.done.wait [#allocation3], 8192  }
  0x12   :  { %3416 = vsyncadd [#allocation3], 4294959104  ;;  %vm41_vm0 = vcmask 261120   ;;  %v35_v0 = vld [vmem:[%s3926_s0] sm:$0xff]  ;;  %v36_v1 = vld [vmem:[%s3926_s0 + $0x8] sm:$0xff]  ;;  %v3420_v21 = vmov 0  }
  0x13   :  { %v42_v2 = vsel %vm41_vm0, %v35_v0, 0.0  ;;  %v45_v3 = vsel %vm41_vm0, %v36_v1, 0.0  ;;  %v81_v14 = vld [vmem:[#allocation2] sm:$0xff]  ;;  %v82_v15 = vld [vmem:[#allocation2 + $0x8] sm:$0xff]  ;;  %3248 = vset.pattern.permute.xlu1 %v3420_v21  ;;  %3247 = vset.pattern.permute.xlu0 %v3420_v21  ;;  %v90_v23 = vld [vmem:[%s3929_s3 + $0x10] sm:$0xff]  ;;  %v3421_v59 = vmov 0.0  }
  0x14   :  { %43 = vadd.xlane.f32.xlu0 %v42_v2  ;;  %v170_v16 = vld [vmem:[#allocation2 + $0x20] sm:$0xff]  ;;  %v85_v17 = vpack.c.bf16 %v82_v15, %v81_v14  ;;  %v171_v18 = vld [vmem:[#allocation2 + $0x28] sm:$0xff]  ;;  %v91_v24 = vld [vmem:[%s3929_s3 + $0x18] sm:$0xff]  ;;  %vm482_vm1 = vcmask 1043456   ;;  %vm3422_vm2 = vmmov 0   ;;  %vm478_vm3 = vcmask 64512  }
  0x15   :  { %v174_v19 = vpack.c.bf16 %v171_v18, %v170_v16  ;;  %v89_v20 = vld [vmem:[%s3929_s3 + $0x8] sm:$0xff]  ;;  %v88_v22 = vld [vmem:[%s3929_s3] sm:$0xff]  ;;  %v2837_v27 = vld [vmem:[%s3929_s3 + $0x30] sm:$0xff]  ;;  %vm668_vm4 = vcmask 130048   ;;  %vm1308_vm5 = vcmask 523264   ;;  %vm2709_vm6 = vcmask 1041409  }
  0x16   :  { %3001 = vmatprep.mubr.msk.bf16.mxu0 %vm41_vm0, %v85_v17  ;;  %v2835_v25 = vld [vmem:[%s3929_s3 + $0x20] sm:$0xff]  ;;  %v2836_v26 = vld [vmem:[%s3929_s3 + $0x28] sm:$0xff]  ;;  %v2838_v28 = vld [vmem:[%s3929_s3 + $0x38] sm:$0xff]  ;;  %vm2712_vm7 = vcmask 1041408  }
  0x17   :  { %3007 = vmatprep.mubr.msk.bf16.mxu1 %vm41_vm0, %v174_v19  ;;  %v2831_v37 = vld [vmem:[%s3930_s4] ss:$0 sm:$0xff]  ;;  %v2832_v41 = vld [vmem:[%s3930_s4 + $0x1] ss:$0 sm:$0xff]  ;;  %v83_v47 = vld [vmem:[#allocation2 + $0x10] sm:$0xff] }
  0x18   :  { %46 = vadd.xlane.f32.xlu0 %v45_v3  ;;  %v84_v48 = vld [vmem:[#allocation2 + $0x18] sm:$0xff]  ;;  %v172_v49 = vld [vmem:[#allocation2 + $0x30] sm:$0xff]  ;;  %v256_v53 = vld [vmem:[#allocation2 + $0x40] sm:$0xff] }
  0x19   :  { %v173_v50 = vld [vmem:[#allocation2 + $0x38] sm:$0xff]  ;;  %v86_v51 = vpack.c.bf16 %v84_v48, %v83_v47  ;;  %v257_v54 = vld [vmem:[#allocation2 + $0x48] sm:$0xff]  ;;  %v258_v56 = vld [vmem:[#allocation2 + $0x50] sm:$0xff] }
  0x1a   :  { %v175_v52 = vpack.c.bf16 %v173_v50, %v172_v49  ;;  %v260_v55 = vpack.c.bf16 %v257_v54, %v256_v53  ;;  %v259_v57 = vld [vmem:[#allocation2 + $0x58] sm:$0xff] }
  0x1b   :  { %v261_v58 = vpack.c.bf16 %v259_v57, %v258_v56 }
  0x2e   :  { %94 = vperm.xlu0 %3247, %v88_v22  }
  0xa1   :  { %v44_v4 = vpop.xlane.xlu0 %43 }
  0xa2   :  { %v49_v5 = vmul.f32 0.03125, %v44_v4 }
  0xa4   :  { %v51_v6 = vsub.f32 %v35_v0, %v49_v5 }
  0xa5   :  { %v47_v7 = vpop.xlane.xlu0 %46 }
  0xa6   :  { %v50_v8 = vmul.f32 0.03125, %v47_v7  ;;  %v53_v9 = vmul.f32 %v51_v6, %v51_v6 }
  0xa8   :  { %v52_v10 = vsub.f32 %v36_v1, %v50_v8  ;;  %v55_v11 = vsel %vm41_vm0, %v53_v9, 0.0 }
  0xa9   :  { %56 = vadd.xlane.f32.xlu1 %v55_v11 }
  0xaa   :  { %v54_v12 = vmul.f32 %v52_v10, %v52_v10 }
  0xac   :  { %v58_v13 = vsel %vm41_vm0, %v54_v12, 0.0 }
  0xad   :  { %59 = vadd.xlane.f32.xlu1 %v58_v13  ;;  %v95_v1 = vpop.permute.xlu0 %94 }
  0xbe   :  { %99 = vperm.xlu1 %3248, %v89_v20  }
  0xc2   :  { %104 = vperm.xlu1 %3248, %v90_v23  }
  0xc6   :  { %109 = vperm.xlu1 %3248, %v91_v24  }
  0xca   :  { %183 = vperm.xlu1 %3248, %v2835_v25  }
  0xce   :  { %188 = vperm.xlu1 %3248, %v2836_v26  }
  0xd2   :  { %193 = vperm.xlu1 %3248, %v2837_v27  }
  0xd6   :  { %198 = vperm.xlu1 %3248, %v2838_v28  }
 0x136   :  { %v57_v29 = vpop.xlane.xlu1 %56 }
 0x137   :  { %v61_v30 = vmul.f32 0.03125, %v57_v29 }
 0x139   :  { %v63_v31 = vadd.f32 1e-12, %v61_v30 }
 0x13a   :  { %v60_v32 = vpop.xlane.xlu1 %59 }
 0x13b   :  { %3297 = vrsqrt.f32 %v63_v31  ;;  %v62_v33 = vmul.f32 0.03125, %v60_v32 }
 0x13d   :  { %v64_v34 = vadd.f32 1e-12, %v62_v33 }
 0x13e   :  { %v100_v60 = vpop.permute.xlu1 %99 }
 0x13f   :  { %3299 = vrsqrt.f32 %v64_v34 }
 0x142   :  { %v105_v61 = vpop.permute.xlu1 %104 }
 0x145   :  { %v3298_v35 = vpop.eup %3297 }
 0x146   :  { %v67_v36 = vmul.f32 %v3298_v35, %v51_v6  ;;  %v110_v62 = vpop.permute.xlu1 %109 }
 0x148   :  { %v73_v40 = vmul.f32 %v2831_v37, %v67_v36 }
 0x149   :  { %v3300_v38 = vpop.eup %3299 }
 0x14a   :  { %v68_v39 = vmul.f32 %v3300_v38, %v52_v10  ;;  %v3507_v43 = vadd.f32 %v2832_v41, %v73_v40  ;;  %v184_v63 = vpop.permute.xlu1 %183 }
 0x14c   :  { %v74_v42 = vmul.f32 %v2831_v37, %v68_v39 }
 0x14e   :  { %v3509_v44 = vadd.f32 %v2832_v41, %v74_v42  ;;  %v189_v0 = vpop.permute.xlu1 %188 }
 0x150   :  { %v87_v45 = vpack.c.bf16 %v3509_v44, %v3507_v43 }
 0x152   :  { %3235 = vmatprep.subr.msk.bf16.mxu0 %vm41_vm0, %v87_v45  ;;  %3236 = vmatprep.subr.msk.bf16.mxu1 %vm41_vm0, %v87_v45  ;;  %v119_v46 = vsel %vm41_vm0, %v87_v45, 0  ;;  %v194_v26 = vpop.permute.xlu1 %193 }
 0x153   :  { %3000 = vmatpush3.bf16.xpose.msra.mxu0 %v119_v46  ;;  %3006 = vmatpush3.bf16.xpose.msra.mxu1 %v119_v46 }
 0x154   :  { %3237 = vmatprep.subr.msk.bf16.mxu0 %vm41_vm0, %v87_v45  ;;  %3017 = vmatprep.subr.bf16.mxu1 %v3421_v59 }
 0x156   :  { %v199_v27 = vpop.permute.xlu1 %198 }
 0x15a   :  { %3002 = vmatmul.mubr.msk.bf16.vlgmr.msra.gmra.mrb[0].mxu0 %vm41_vm0, %v86_v51  ;;  %3008 = vmatmul.mubr.msk.bf16.vlgmr.msra.gmra.mrb[0].mxu1 %vm41_vm0, %v175_v52  ;;  %v37_v52 = vld [vmem:[%s3927_s1] sm:$0xff] }
 0x15b   :  { %3012 = vmatpush3.bf16.xpose.msra.mxu0 %v119_v46  ;;  %3013 = vmatprep.mubr.msk.bf16.mxu0 %vm41_vm0, %v260_v55  ;;  %v38_v55 = vld [vmem:[%s3927_s1 + $0x8] sm:$0xff] }
 0x15c   :  { %3023 = vmatprep.subr.bf16.mxu0 %v3421_v59  ;;  %3019 = vmatprep.mubr.msk.bf16.mxu1 %vm3422_vm2, %v3421_v59 }
 0x162   :  { %3014 = vmatmul.mubr.msk.bf16.vlgmr.msra.gmra.mrb[4].mxu0 %vm41_vm0, %v261_v58 }
 0x163   :  { %3025 = vmatprep.mubr.msk.bf16.mxu0 %vm3422_vm2, %v3421_v59 }
 0x22d   :  { %v3003_v2 = vpop.f32.mrb[0].mxu0  ;;  %v3009_v3 = vpop.f32.mrb[0].mxu1 }
 0x22e   :  { %v155_v4 = vpop.f32.mrb[1].mxu0  ;;  %v241_v5 = vpop.f32.mrb[1].mxu1  ;;  %v164_v9 = vadd.f32 %v3003_v2, %v105_v61  ;;  %v250_v28 = vadd.f32 %v3009_v3, %v194_v26 }
 0x22f   :  { %v242_v6 = vadd.f32 %v241_v5, %v184_v63  ;;  %v3004_v7 = vpop.f32.mrb[2].mxu0  ;;  %v3010_v8 = vpop.f32.mrb[2].mxu1  ;;  %v156_v14 = vadd.f32 %v155_v4, %v95_v1 }
 0x230   :  { %v167_v10 = vadd.f32 %v3004_v7, %v110_v62  ;;  %v158_v11 = vpop.f32.mrb[3].mxu0  ;;  %v244_v12 = vpop.f32.mrb[3].mxu1  ;;  %v253_v29 = vadd.f32 %v3010_v8, %v199_v27  ;;  %v476_v32 = vpack.c.bf16 %v250_v28, %v250_v28  ;;  %v2841_v27 = vld [vmem:[%s3929_s3 + $0x40] sm:$0xff] }
 0x231   :  { %v474_v13 = vpack.c.bf16 %v242_v6, %v242_v6  ;;  %v159_v15 = vadd.f32 %v158_v11, %v100_v60  ;;  %v245_v16 = vadd.f32 %v244_v12, %v189_v0 }
 0x232   :  { %v3261_v17 = vpack.i.bf16 %v167_v10, %v164_v9  ;;  %v477_v33 = vpack.c.bf16 %v253_v29, %v253_v29  ;;  %v578_v42 = vsel %vm482_vm1, %v476_v32, 0 }
 0x233   :  { %v484_v18 = vsel %vm482_vm1, %v474_v13, 0  ;;  %v3249_v19 = vpack.i.bf16 %v159_v15, %v156_v14  ;;  %v475_v20 = vpack.c.bf16 %v245_v16, %v245_v16 }
 0x234   :  { %3262 = vxpose.xlu0.b32.start.end [1/1] (short) (narrow) %v3261_v17, 16  ;;  %3018 = vmatpush3.bf16.msra.mxu1 %v484_v18  ;;  %v625_v45 = vsel %vm482_vm1, %v477_v33, 0 }
 0x235   :  { %v531_v21 = vsel %vm482_vm1, %v475_v20, 0  ;;  %3250 = vxpose.xlu1.b32.start.end [1/1] (short) (narrow) %v3249_v19, 16  ;;  %3029 = vmatprep.subr.bf16.mxu1 %v3421_v59  ;;  %v3531_v22 = vpop.f32.mrb[4].mxu0 }
 0x236   :  { %3024 = vmatpush3.bf16.msra.mxu0 %v531_v21  ;;  %v3533_v23 = vpop.f32.mrb[5].mxu0 }
 0x237   :  { %3035 = vmatprep.subr.bf16.mxu0 %v3421_v59  ;;  %v3535_v24 = vpop.f32.mrb[6].mxu0 }
 0x238   :  { %v3537_v25 = vpop.f32.mrb[7].mxu0 }
 0x2b4   :  { %v3263_v30 = vpop.trf.xlu0 }
 0x2b5   :  { %v3251_v31 = vpop.trf.xlu1  ;;  %v3267_v46 = vunpack.i.h.bf16 %v3263_v30  ;;  %v3264_v47 = vunpack.i.l.bf16 %v3263_v30 }
 0x2b6   :  { %v3255_v35 = vunpack.i.h.bf16 %v3251_v31  ;;  %v3252_v36 = vunpack.i.l.bf16 %v3251_v31 }
 0x2b8   :  { %v3268_v34 = vpop.trf.xlu0 }
 0x2b9   :  { %v3256_v37 = vpop.trf.xlu1  ;;  %v3272_v48 = vunpack.i.h.bf16 %v3268_v34  ;;  %v3269_v49 = vunpack.i.l.bf16 %v3268_v34 }
 0x2ba   :  { %v3260_v38 = vunpack.i.h.bf16 %v3256_v37  ;;  %v3257_v39 = vunpack.i.l.bf16 %v3256_v37 }
 0x2bb   :  { %v472_v50 = vpack.c.bf16 %v3269_v49, %v3264_v47  ;;  %v473_v51 = vpack.c.bf16 %v3272_v48, %v3267_v46 }
 0x2bc   :  { %v470_v40 = vpack.c.bf16 %v3257_v39, %v3252_v36  ;;  %v471_v41 = vpack.c.bf16 %v3260_v38, %v3255_v35 }
 0x2be   :  { %3020 = vmatmul.mubr.msk.bf16.vlgmr.msra.gmra.mrb[4].mxu1 %vm478_vm3, %v470_v40  ;;  %3026 = vmatmul.mubr.msk.bf16.vlgmr.msra.gmra.mrb[8].mxu0 %vm478_vm3, %v471_v41 }
 0x2bf   :  { %3030 = vmatpush3.bf16.msra.mxu1 %v578_v42  ;;  %3036 = vmatpush3.bf16.msra.mxu0 %v625_v45 }
 0x2c0   :  { %3031 = vmatprep.mubr.msk.bf16.mxu1 %vm3422_vm2, %v3421_v59  ;;  %3037 = vmatprep.mubr.msk.bf16.mxu0 %vm3422_vm2, %v3421_v59 }
 0x2c1   :  { %3041 = vmatprep.subr.bf16.mxu1 %v3421_v59  ;;  %3047 = vmatprep.subr.bf16.mxu0 %v3421_v59 }
 0x2c6   :  { %3032 = vmatmul.mubr.msk.bf16.vlgmr.msra.gmra.mrb[8].mxu1 %vm478_vm3, %v472_v50  ;;  %3038 = vmatmul.mubr.msk.bf16.vlgmr.msra.gmra.mrb[12].mxu0 %vm478_vm3, %v473_v51 }
 0x2c7   :  { %3043 = vmatprep.mubr.msk.bf16.mxu1 %vm3422_vm2, %v3421_v59  ;;  %3049 = vmatprep.mubr.msk.bf16.mxu0 %vm3422_vm2, %v3421_v59 }
 0x391   :  { %v520_v53 = vpop.f32.mrb[4].mxu1  ;;  %v567_v54 = vpop.f32.mrb[8].mxu0 }
 0x392   :  { %v521_v56 = vadd.f32 %v520_v53, %v37_v52  ;;  %v3021_v57 = vpop.f32.mrb[5].mxu1  ;;  %v3027_v58 = vpop.f32.mrb[9].mxu0  ;;  %v568_v62 = vadd.f32 %v567_v54, %v37_v52 }
 0x393   :  { %v523_v60 = vpop.f32.mrb[6].mxu1  ;;  %v570_v61 = vpop.f32.mrb[10].mxu0 }
 0x394   :  { %v524_v63 = vadd.f32 %v523_v60, %v38_v55  ;;  %v3022_v0 = vpop.f32.mrb[7].mxu1  ;;  %v3028_v1 = vpop.f32.mrb[11].mxu0  ;;  %v669_v2 = vsel %vm668_vm4, %v521_v56, -inf  ;;  %v571_v3 = vadd.f32 %v570_v61, %v38_v55  ;;  %v675_v5 = vsel %vm668_vm4, %v568_v62, -inf }
 0x395   :  { %670 = vmax.xlane.f32.xlu0 %v669_v2 }
 0x396   :  { %v672_v4 = vsel %vm668_vm4, %v524_v63, -inf  ;;  %v678_v11 = vsel %vm668_vm4, %v571_v3, -inf }
 0x397   :  { %673 = vmax.xlane.f32.xlu1 %v672_v4 }
 0x399   :  { %676 = vmax.xlane.f32.xlu0 %v675_v5  ;;  %v614_v6 = vpop.f32.mrb[8].mxu1  ;;  %v661_v7 = vpop.f32.mrb[12].mxu0 }
 0x39a   :  { %v615_v8 = vadd.f32 %v614_v6, %v37_v52  ;;  %v3033_v9 = vpop.f32.mrb[9].mxu1  ;;  %v3039_v10 = vpop.f32.mrb[13].mxu0  ;;  %v662_v14 = vadd.f32 %v661_v7, %v37_v52 }
 0x39b   :  { %679 = vmax.xlane.f32.xlu1 %v678_v11  ;;  %v617_v12 = vpop.f32.mrb[10].mxu1  ;;  %v664_v13 = vpop.f32.mrb[14].mxu0  ;;  %v2843_v10 = vld [vmem:[%s3929_s3 + $0x50] sm:$0xff]  ;;  %v2844_v11 = vld [vmem:[%s3929_s3 + $0x58] sm:$0xff] }
 0x39c   :  { %v618_v15 = vadd.f32 %v617_v12, %v38_v55  ;;  %v3034_v16 = vpop.f32.mrb[11].mxu1  ;;  %v3040_v17 = vpop.f32.mrb[15].mxu0  ;;  %v681_v18 = vsel %vm668_vm4, %v615_v8, -inf  ;;  %v665_v19 = vadd.f32 %v664_v13, %v38_v55  ;;  %v687_v21 = vsel %vm668_vm4, %v662_v14, -inf  ;;  %v2842_v12 = vld [vmem:[%s3929_s3 + $0x48] sm:$0xff] }
 0x39d   :  { %682 = vmax.xlane.f32.xlu0 %v681_v18 }
 0x39e   :  { %v684_v20 = vsel %vm668_vm4, %v618_v15, -inf  ;;  %v690_v26 = vsel %vm668_vm4, %v665_v19, -inf }
 0x39f   :  { %685 = vmax.xlane.f32.xlu1 %v684_v20 }
 0x3a1   :  { %688 = vmax.xlane.f32.xlu0 %v687_v21 }
 0x3a3   :  { %691 = vmax.xlane.f32.xlu1 %v690_v26 }
 0x3b7   :  { %269 = vperm.xlu0 %3247, %v2841_v27  }
 0x422   :  { %v671_v28 = vpop.xlane.xlu0 %670 }
 0x423   :  { %v693_v29 = vsub.f32 %v521_v56, %v671_v28 }
 0x424   :  { %v674_v30 = vpop.xlane.xlu1 %673 }
 0x425   :  { %v701_v31 = vmul.f32 1.442695, %v693_v29  ;;  %v694_v32 = vsub.f32 %v524_v63, %v674_v30 }
 0x426   :  { %v677_v33 = vpop.xlane.xlu0 %676 }
 0x427   :  { %3301 = vpow2.f32 %v701_v31  ;;  %v703_v34 = vmul.f32 1.442695, %v694_v32  ;;  %v695_v35 = vsub.f32 %v568_v62, %v677_v33 }
 0x428   :  { %v680_v36 = vpop.xlane.xlu1 %679 }
 0x429   :  { %3303 = vpow2.f32 %v703_v34  ;;  %v705_v37 = vmul.f32 1.442695, %v695_v35  ;;  %v696_v38 = vsub.f32 %v571_v3, %v680_v36 }
 0x42a   :  { %v683_v39 = vpop.xlane.xlu0 %682 }
 0x42b   :  { %3305 = vpow2.f32 %v705_v37  ;;  %v707_v40 = vmul.f32 1.442695, %v696_v38  ;;  %v697_v41 = vsub.f32 %v615_v8, %v683_v39 }
 0x42c   :  { %v686_v42 = vpop.xlane.xlu1 %685 }
 0x42d   :  { %3307 = vpow2.f32 %v707_v40  ;;  %v709_v45 = vmul.f32 1.442695, %v697_v41  ;;  %v698_v46 = vsub.f32 %v618_v15, %v686_v42 }
 0x42e   :  { %v689_v47 = vpop.xlane.xlu0 %688 }
 0x42f   :  { %3309 = vpow2.f32 %v709_v45  ;;  %v711_v48 = vmul.f32 1.442695, %v698_v46  ;;  %v699_v49 = vsub.f32 %v662_v14, %v689_v47 }
 0x430   :  { %v692_v50 = vpop.xlane.xlu1 %691 }
 0x431   :  { %v3302_v51 = vpop.eup %3301  ;;  %3311 = vpow2.f32 %v711_v48  ;;  %v713_v52 = vmul.f32 1.442695, %v699_v49  ;;  %v700_v53 = vsub.f32 %v665_v19, %v692_v50 }
 0x432   :  { %v717_v54 = vsel %vm668_vm4, %v3302_v51, 0.0 }
 0x433   :  { %v3304_v55 = vpop.eup %3303  ;;  %3313 = vpow2.f32 %v713_v52  ;;  %v715_v56 = vmul.f32 1.442695, %v700_v53  ;;  %718 = vadd.xlane.f32.xlu0 %v717_v54 }
 0x434   :  { %v720_v57 = vsel %vm668_vm4, %v3304_v55, 0.0 }
 0x435   :  { %v3574_v58 = vpop.eup %3305  ;;  %721 = vadd.xlane.f32.xlu1 %v720_v57  ;;  %3315 = vpow2.f32 %v715_v56  ;;  %v953_v56 = vld [vmem:[#allocation2 + $0x60] sm:$0xff] }
 0x436   :  { %v270_v60 = vpop.permute.xlu0 %269  ;;  %v723_v61 = vsel %vm668_vm4, %v3574_v58, 0.0  ;;  %v961_v57 = vpack.c.bf16 %v953_v56, %v953_v56 }
 0x437   :  { %v3578_v62 = vpop.eup %3307  ;;  %v328_v63 = vadd.f32 %v3533_v23, %v270_v60  ;;  %724 = vadd.xlane.f32.xlu0 %v723_v61  ;;  %v954_v60 = vld [vmem:[#allocation2 + $0x68] sm:$0xff] }
 0x438   :  { %v726_v0 = vsel %vm668_vm4, %v3578_v62, 0.0  ;;  %v962_v61 = vpack.c.bf16 %v954_v60, %v954_v60 }
 0x439   :  { %v3310_v1 = vpop.eup %3309  ;;  %v761_v2 = vpack.c.bf16 %v328_v63, %v328_v63  ;;  %727 = vadd.xlane.f32.xlu1 %v726_v0  ;;  %v955_v63 = vld [vmem:[#allocation2 + $0x70] sm:$0xff] }
 0x43a   :  { %v729_v3 = vsel %vm668_vm4, %v3310_v1, 0.0  ;;  %v963_v0 = vpack.c.bf16 %v955_v63, %v955_v63 }
 0x43b   :  { %v3312_v4 = vpop.eup %3311  ;;  %v769_v5 = vsel %vm668_vm4, %v761_v2, 0  ;;  %730 = vadd.xlane.f32.xlu0 %v729_v3 }
 0x43c   :  { %3042 = vmatpush3.bf16.xpose.msra.mxu1 %v769_v5  ;;  %v732_v6 = vsel %vm668_vm4, %v3312_v4, 0.0 }
 0x43d   :  { %v3586_v7 = vpop.eup %3313  ;;  %733 = vadd.xlane.f32.xlu1 %v732_v6  ;;  %3053 = vmatprep.subr.bf16.mxu1 %v3421_v59  ;;  %v1063_v6 = vsel %vm482_vm1, %v963_v0, 0 }
 0x43e   :  { %v735_v23 = vsel %vm668_vm4, %v3586_v7, 0.0 }
 0x43f   :  { %v3591_v8 = vpop.eup %3315 }
 0x440   :  { %v738_v9 = vsel %vm668_vm4, %v3591_v8, 0.0 }
 0x441   :  { %736 = vadd.xlane.f32.xlu1 %v735_v23 }
 0x445   :  { %739 = vadd.xlane.f32.xlu1 %v738_v9  ;;  %v956_v9 = vld [vmem:[#allocation2 + $0x78] sm:$0xff] }
 0x451   :  { %279 = vperm.xlu0 %3247, %v2843_v10  }
 0x455   :  { %284 = vperm.xlu0 %3247, %v2844_v11  }
 0x456   :  { %274 = vperm.xlu1 %3248, %v2842_v12   ;;  %v964_v12 = vpack.c.bf16 %v956_v9, %v956_v9  ;;  %v1216_v9 = vld [vmem:[#allocation2 + $0x80] sm:$0xff] }
 0x4c0   :  { %v719_v13 = vpop.xlane.xlu0 %718 }
 0x4c1   :  { %3317 = vrcp.f32 %v719_v13 }
 0x4c2   :  { %v722_v14 = vpop.xlane.xlu1 %721 }
 0x4c3   :  { %3319 = vrcp.f32 %v722_v14 }
 0x4c4   :  { %v725_v15 = vpop.xlane.xlu0 %724 }
 0x4c6   :  { %v728_v16 = vpop.xlane.xlu1 %727 }
 0x4c8   :  { %v731_v17 = vpop.xlane.xlu0 %730 }
 0x4ca   :  { %v734_v18 = vpop.xlane.xlu1 %733 }
 0x4cb   :  { %v3318_v19 = vpop.eup %3317  ;;  %3321 = vrcp.f32 %v734_v18  ;;  %v1110_v18 = vsel %vm482_vm1, %v964_v12, 0  ;;  %v1219_v12 = vld [vmem:[#allocation2 + $0x98] sm:$0xff] }
 0x4cc   :  { %3323 = vrcp.f32 %v731_v17  ;;  %v749_v21 = vmul.f32 %v3318_v19, %v3302_v51 }
 0x4cd   :  { %v3320_v20 = vpop.eup %3319  ;;  %3325 = vrcp.f32 %v728_v16 }
 0x4ce   :  { %v750_v26 = vmul.f32 %v3320_v20, %v3304_v55  ;;  %v737_v27 = vpop.xlane.xlu1 %736  ;;  %3327 = vrcp.f32 %v725_v15 }
 0x4d0   :  { %v280_v28 = vpop.permute.xlu0 %279  ;;  %v757_v29 = vpack.c.bf16 %v750_v26, %v749_v21 }
 0x4d1   :  { %v336_v30 = vadd.f32 %v3531_v22, %v280_v28 }
 0x4d2   :  { %3044 = vmatmul.mubr.msk.bf16.vlgmr.msra.gmra.mrb[12].mxu1 %vm668_vm4, %v757_v29  ;;  %v740_v31 = vpop.xlane.xlu1 %739 }
 0x4d3   :  { %v763_v32 = vpack.c.bf16 %v336_v30, %v336_v30  ;;  %3055 = vmatprep.mubr.msk.bf16.mxu1 %vm3422_vm2, %v3421_v59  ;;  %3329 = vrcp.f32 %v740_v31 }
 0x4d4   :  { %v285_v22 = vpop.permute.xlu0 %284  ;;  %3331 = vrcp.f32 %v737_v27 }
 0x4d5   :  { %v3322_v33 = vpop.eup %3321  ;;  %v863_v34 = vsel %vm668_vm4, %v763_v32, 0  ;;  %v339_v42 = vadd.f32 %v3535_v24, %v285_v22 }
 0x4d6   :  { %v3324_v35 = vpop.eup %3323  ;;  %3054 = vmatpush3.bf16.xpose.msra.mxu1 %v863_v34  ;;  %v275_v36 = vpop.permute.xlu1 %274  ;;  %v754_v37 = vmul.f32 %v3322_v33, %v3312_v4 }
 0x4d7   :  { %v331_v38 = vadd.f32 %v3537_v25, %v275_v36  ;;  %3065 = vmatprep.subr.bf16.mxu1 %v3421_v59  ;;  %v753_v39 = vmul.f32 %v3324_v35, %v3310_v1  ;;  %v3326_v41 = vpop.eup %3325  ;;  %v764_v49 = vpack.c.bf16 %v339_v42, %v339_v42 }
 0x4d8   :  { %v3328_v47 = vpop.eup %3327  ;;  %v752_v48 = vmul.f32 %v3326_v41, %v3578_v62  ;;  %v1016_v62 = vsel %vm482_vm1, %v962_v61, 0 }
 0x4d9   :  { %v762_v40 = vpack.c.bf16 %v331_v38, %v331_v38  ;;  %v759_v46 = vpack.c.bf16 %v754_v37, %v753_v39  ;;  %v751_v25 = vmul.f32 %v3328_v47, %v3574_v58  ;;  %v910_v24 = vsel %vm668_vm4, %v764_v49, 0 }
 0x4da   :  { %v969_v58 = vsel %vm482_vm1, %v961_v57, 0 }
 0x4db   :  { %v816_v45 = vsel %vm668_vm4, %v762_v40, 0  ;;  %v758_v50 = vpack.c.bf16 %v752_v48, %v751_v25 }
 0x4dc   :  { %3048 = vmatpush3.bf16.xpose.msra.mxu0 %v816_v45 }
 0x4dd   :  { %3056 = vmatmul.mubr.msk.bf16.vlgmr.msra.gmra.mrb[16].mxu1 %vm668_vm4, %v759_v46  ;;  %3059 = vmatprep.subr.bf16.mxu0 %v3421_v59  ;;  %v3330_v51 = vpop.eup %3329 }
 0x4de   :  { %3067 = vmatprep.mubr.msk.bf16.mxu1 %vm3422_vm2, %v3421_v59  ;;  %v3332_v52 = vpop.eup %3331  ;;  %v756_v53 = vmul.f32 %v3330_v51, %v3591_v8  ;;  %3066 = vmatpush3.bf16.msra.mxu1 %v969_v58 }
 0x4df   :  { %v755_v54 = vmul.f32 %v3332_v52, %v3586_v7  ;;  %3077 = vmatprep.subr.bf16.mxu1 %v3421_v59 }
 0x4e1   :  { %v760_v55 = vpack.c.bf16 %v756_v53, %v755_v54 }
 0x4e3   :  { %3050 = vmatmul.mubr.msk.bf16.vlgmr.msra.gmra.mrb[16].mxu0 %vm668_vm4, %v758_v50 }
 0x4e4   :  { %3060 = vmatpush3.bf16.xpose.msra.mxu0 %v910_v24  ;;  %3061 = vmatprep.mubr.msk.bf16.mxu0 %vm3422_vm2, %v3421_v59  ;;  %v2859_v24 = vld [vmem:[%s3930_s4 + $0x2] ss:$0 sm:$0xff] }
 0x4e5   :  { %3071 = vmatprep.subr.bf16.mxu0 %v3421_v59 }
 0x4eb   :  { %3062 = vmatmul.mubr.msk.bf16.vlgmr.msra.gmra.mrb[20].mxu0 %vm668_vm4, %v760_v55 }
 0x4ec   :  { %3073 = vmatprep.mubr.msk.bf16.mxu0 %vm3422_vm2, %v3421_v59  ;;  %3072 = vmatpush3.bf16.msra.mxu0 %v1016_v62 }
 0x4ed   :  { %3083 = vmatprep.subr.bf16.mxu0 %v3421_v59 }
 0x5a5   :  { %v805_v1 = vpop.f32.mrb[12].mxu1 }
 0x5a6   :  { %v3045_v2 = vpop.f32.mrb[13].mxu1 }
 0x5a7   :  { %v808_v3 = vpop.f32.mrb[14].mxu1 }
 0x5a8   :  { %v957_v4 = vpack.c.bf16 %v808_v3, %v805_v1  ;;  %v3046_v5 = vpop.f32.mrb[15].mxu1 }
 0x5aa   :  { %3068 = vmatmul.mubr.msk.bf16.vlgmr.msra.gmra.mrb[20].mxu1 %vm478_vm3, %v957_v4 }
 0x5ab   :  { %3078 = vmatpush3.bf16.msra.mxu1 %v1063_v6  ;;  %3079 = vmatprep.mubr.msk.bf16.mxu1 %vm3422_vm2, %v3421_v59 }
 0x5ac   :  { %3089 = vmatprep.subr.bf16.mxu1 %v3421_v59 }
 0x5b0   :  { %v899_v7 = vpop.f32.mrb[16].mxu1 }
 0x5b1   :  { %v3057_v23 = vpop.f32.mrb[17].mxu1 }
 0x5b2   :  { %v902_v8 = vpop.f32.mrb[18].mxu1 }
 0x5b3   :  { %v959_v10 = vpack.c.bf16 %v902_v8, %v899_v7  ;;  %v3058_v11 = vpop.f32.mrb[19].mxu1 }
 0x5b4   :  { %v1218_v11 = vld [vmem:[#allocation2 + $0x90] sm:$0xff] }
 0x5b5   :  { %3080 = vmatmul.mubr.msk.bf16.vlgmr.msra.gmra.mrb[24].mxu1 %vm478_vm3, %v959_v10 }
 0x5b6   :  { %v852_v13 = vpop.f32.mrb[16].mxu0  ;;  %3093 = vmatprep.mubr.msk.bf16.mxu1 %vm3422_vm2, %v3421_v59 }
 0x5b7   :  { %v3051_v14 = vpop.f32.mrb[17].mxu0 }
 0x5b8   :  { %v855_v15 = vpop.f32.mrb[18].mxu0 }
 0x5b9   :  { %v958_v16 = vpack.c.bf16 %v855_v15, %v852_v13  ;;  %v3052_v17 = vpop.f32.mrb[19].mxu0  ;;  %v1222_v13 = vpack.c.bf16 %v1219_v12, %v1218_v11 }
 0x5bb   :  { %3074 = vmatmul.mubr.msk.bf16.vlgmr.msra.gmra.mrb[24].mxu0 %vm478_vm3, %v958_v16 }
 0x5bc   :  { %3084 = vmatpush3.bf16.msra.mxu0 %v1110_v18  ;;  %3085 = vmatprep.mubr.msk.bf16.mxu0 %vm3422_vm2, %v3421_v59 }
 0x5bd   :  { %3097 = vmatprep.subr.bf16.mxu0 %v3421_v59 }
 0x5be   :  { %v946_v19 = vpop.f32.mrb[20].mxu0 }
 0x5bf   :  { %v3063_v20 = vpop.f32.mrb[21].mxu0 }
 0x5c0   :  { %v949_v21 = vpop.f32.mrb[22].mxu0 }
 0x5c1   :  { %v960_v26 = vpack.c.bf16 %v949_v21, %v946_v19  ;;  %v3064_v27 = vpop.f32.mrb[23].mxu0  ;;  %v2860_v21 = vld [vmem:[%s3930_s4 + $0x3] ss:$0 sm:$0xff] }
 0x5c3   :  { %3086 = vmatmul.mubr.msk.bf16.vlgmr.msra.gmra.mrb[28].mxu0 %vm478_vm3, %v960_v26 }
 0x5c4   :  { %3105 = vmatprep.mubr.msk.bf16.mxu0 %vm3422_vm2, %v3421_v59 }
 0x67d   :  { %v1005_v28 = vpop.f32.mrb[20].mxu1 }
 0x67e   :  { %v3069_v29 = vpop.f32.mrb[21].mxu1  ;;  %v1153_v37 = vsel %vm41_vm0, %v1005_v28, 0.0 }
 0x67f   :  { %v1008_v30 = vpop.f32.mrb[22].mxu1 }
 0x680   :  { %v3070_v31 = vpop.f32.mrb[23].mxu1  ;;  %v1160_v41 = vsel %vm41_vm0, %v1008_v30, 0.0  ;;  %v2861_v30 = vld [vmem:[%s3930_s4 + $0x4] ss:$0 sm:$0xff] }
 0x688   :  { %v1099_v32 = vpop.f32.mrb[24].mxu1 }
 0x689   :  { %v3081_v33 = vpop.f32.mrb[25].mxu1  ;;  %v1156_v42 = vsel %vm41_vm0, %v1099_v32, 0.0 }
 0x68a   :  { %v1102_v34 = vpop.f32.mrb[26].mxu1 }
 0x68b   :  { %v3082_v35 = vpop.f32.mrb[27].mxu1  ;;  %v1163_v25 = vsel %vm41_vm0, %v1102_v34, 0.0 }
 0x68c   :  { %v1290_v35 = vld [vmem:[#allocation2 + $0xa0] sm:$0xff] }
 0x68e   :  { %v1052_v36 = vpop.f32.mrb[24].mxu0 }
 0x68f   :  { %v1154_v38 = vsel %vm41_vm0, %v1052_v36, 0.0  ;;  %v3075_v22 = vpop.f32.mrb[25].mxu0  ;;  %v1291_v36 = vld [vmem:[#allocation2 + $0xa8] sm:$0xff] }
 0x690   :  { %v1155_v39 = vadd.f32 %v1154_v38, %v1153_v37  ;;  %v1055_v40 = vpop.f32.mrb[26].mxu0  ;;  %v1292_v37 = vld [vmem:[#allocation2 + $0xb0] sm:$0xff]  ;;  %v1299_v38 = vpack.c.bf16 %v1291_v36, %v1290_v35  ;;  %v1293_v22 = vld [vmem:[#allocation2 + $0xb8] sm:$0xff]  ;;  %v2874_v35 = vld [vmem:[%s3929_s3 + $0x80] sm:$0xff] }
 0x691   :  { %v1161_v45 = vsel %vm41_vm0, %v1055_v40, 0.0  ;;  %v3076_v46 = vpop.f32.mrb[27].mxu0  ;;  %v1294_v40 = vld [vmem:[#allocation2 + $0xc0] sm:$0xff]  ;;  %v2875_v36 = vld [vmem:[%s3929_s3 + $0x88] sm:$0xff] }
 0x692   :  { %v1162_v47 = vadd.f32 %v1161_v45, %v1160_v41  ;;  %v1157_v48 = vadd.f32 %v1156_v42, %v1155_v39  ;;  %3098 = vmatpush3.bf16.msra.mxu0 %v1299_v38  ;;  %v1300_v39 = vpack.c.bf16 %v1293_v22, %v1292_v37  ;;  %v1295_v41 = vld [vmem:[#allocation2 + $0xc8] sm:$0xff]  ;;  %v1296_v45 = vld [vmem:[#allocation2 + $0xd0] sm:$0xff]  ;;  %v1297_v46 = vld [vmem:[#allocation2 + $0xd8] sm:$0xff] }
 0x693   :  { %3099 = vmatprep.subr.bf16.mxu0 %v3421_v59  ;;  %v1301_v42 = vpack.c.bf16 %v1295_v41, %v1294_v40  ;;  %v2876_v37 = vld [vmem:[%s3929_s3 + $0x90] sm:$0xff]  ;;  %v2877_v38 = vld [vmem:[%s3929_s3 + $0x98] sm:$0xff]  ;;  %v1395_v22 = vld [vmem:[#allocation2 + $0xe0] sm:$0xff] }
 0x694   :  { %v1164_v49 = vadd.f32 %v1163_v25, %v1162_v47  ;;  %v1302_v47 = vpack.c.bf16 %v1297_v46, %v1296_v45 }
 0x696   :  { %v1146_v50 = vpop.f32.mrb[28].mxu0  ;;  %3100 = vmatpush3.bf16.msra.mxu0 %v1300_v39  ;;  %v1396_v39 = vld [vmem:[#allocation2 + $0xe8] sm:$0xff] }
 0x697   :  { %v1158_v51 = vsel %vm41_vm0, %v1146_v50, 0.0  ;;  %v3087_v52 = vpop.f32.mrb[29].mxu0  ;;  %3101 = vmatprep.subr.bf16.mxu0 %v3421_v59  ;;  %v1399_v40 = vpack.c.bf16 %v1396_v39, %v1395_v22 }
 0x698   :  { %v1159_v53 = vadd.f32 %v1158_v51, %v1157_v48  ;;  %v1149_v54 = vpop.f32.mrb[30].mxu0  ;;  %v2862_v48 = vld [vmem:[%s3930_s4 + $0x5] ss:$0 sm:$0xff] }
 0x699   :  { %v1165_v55 = vsel %vm41_vm0, %v1149_v54, 0.0  ;;  %v3088_v56 = vpop.f32.mrb[31].mxu0 }
 0x69a   :  { %v1172_v57 = vadd.f32 %v2859_v24, %v1159_v53  ;;  %v1166_v58 = vadd.f32 %v1165_v55, %v1164_v49  ;;  %3102 = vmatpush3.bf16.msra.mxu0 %v1301_v42 }
 0x69b   :  { %3103 = vmatprep.subr.bf16.mxu0 %v3421_v59 }
 0x69c   :  { %v1173_v60 = vadd.f32 %v2859_v24, %v1166_v58  ;;  %v1174_v61 = vadd.f32 %v1172_v57, %v3507_v43 }
 0x69e   :  { %v1178_v62 = vsel %vm41_vm0, %v1174_v61, 0.0  ;;  %v1175_v63 = vadd.f32 %v1173_v60, %v3509_v44  ;;  %v1217_v44 = vld [vmem:[#allocation2 + $0x88] sm:$0xff]  ;;  %3104 = vmatpush3.bf16.msra.mxu0 %v1302_v47 }
 0x69f   :  { %1179 = vadd.xlane.f32.xlu1 %v1178_v62  ;;  %v1221_v10 = vpack.c.bf16 %v1217_v44, %v1216_v9 }
 0x6a0   :  { %v1181_v0 = vsel %vm41_vm0, %v1175_v63, 0.0 }
 0x6a1   :  { %1182 = vadd.xlane.f32.xlu0 %v1181_v0  ;;  %3090 = vmatpush3.bf16.msra.mxu1 %v1221_v10 }
 0x6a2   :  { %3091 = vmatprep.subr.bf16.mxu1 %v3421_v59 }
 0x6a5   :  { %3092 = vmatpush3.bf16.msra.mxu1 %v1222_v13 }
 0x72c   :  { %v1180_v1 = vpop.xlane.xlu1 %1179 }
 0x72d   :  { %v1184_v2 = vmul.f32 0.03125, %v1180_v1 }
 0x72e   :  { %v1183_v3 = vpop.xlane.xlu0 %1182 }
 0x72f   :  { %v1186_v4 = vsub.f32 %v1174_v61, %v1184_v2  ;;  %v1185_v5 = vmul.f32 0.03125, %v1183_v3 }
 0x731   :  { %v1187_v6 = vsub.f32 %v1175_v63, %v1185_v5  ;;  %v1188_v7 = vmul.f32 %v1186_v4, %v1186_v4 }
 0x733   :  { %v1190_v23 = vsel %vm41_vm0, %v1188_v7, 0.0  ;;  %v1189_v8 = vmul.f32 %v1187_v6, %v1187_v6 }
 0x734   :  { %1191 = vadd.xlane.f32.xlu0 %v1190_v23 }
 0x735   :  { %v1193_v43 = vsel %vm41_vm0, %v1189_v8, 0.0  ;;  %v2864_v8 = vld [vmem:[%s3930_s4 + $0x6] ss:$0 sm:$0xff] }
 0x736   :  { %1194 = vadd.xlane.f32.xlu1 %v1193_v43 }
 0x7c1   :  { %v1192_v14 = vpop.xlane.xlu0 %1191 }
 0x7c2   :  { %v1196_v15 = vmul.f32 0.03125, %v1192_v14 }
 0x7c3   :  { %v1195_v16 = vpop.xlane.xlu1 %1194 }
 0x7c4   :  { %v1198_v17 = vadd.f32 1e-12, %v1196_v15  ;;  %v1197_v18 = vmul.f32 0.03125, %v1195_v16 }
 0x7c6   :  { %3333 = vrsqrt.f32 %v1198_v17  ;;  %v1199_v19 = vadd.f32 1e-12, %v1197_v18 }
 0x7c8   :  { %3335 = vrsqrt.f32 %v1199_v19 }
 0x7d0   :  { %v3334_v20 = vpop.eup %3333 }
 0x7d1   :  { %v1202_v26 = vmul.f32 %v3334_v20, %v1186_v4 }
 0x7d2   :  { %v3336_v27 = vpop.eup %3335 }
 0x7d3   :  { %v1208_v28 = vmul.f32 %v2860_v21, %v1202_v26  ;;  %v1203_v29 = vmul.f32 %v3336_v27, %v1187_v6 }
 0x7d5   :  { %v1209_v31 = vmul.f32 %v2860_v21, %v1203_v29  ;;  %v1214_v32 = vadd.f32 %v2861_v30, %v1208_v28 }
 0x7d7   :  { %v1215_v33 = vadd.f32 %v2861_v30, %v1209_v31  ;;  %v2869_v31 = vld [vmem:[%s3929_s3 + $0x68] sm:$0xff] }
 0x7d9   :  { %v1220_v34 = vpack.c.bf16 %v1215_v33, %v1214_v32 }
 0x7db   :  { %3094 = vmatmul.mubr.msk.bf16.vlgmr.msra.gmra.mrb[28].mxu1 %vm41_vm0, %v1220_v34  ;;  %v2871_v34 = vld [vmem:[%s3929_s3 + $0x78] sm:$0xff] }
 0x7dc   :  { %3111 = vmatprep.mubr.msk.bf16.mxu1 %vm41_vm0, %v1399_v40 }
 0x8ae   :  { %v1265_v25 = vpop.f32.mrb[28].mxu1 }
 0x8af   :  { %v1266_v49 = vadd.f32 %v2862_v48, %v1265_v25  ;;  %v3095_v50 = vpop.f32.mrb[29].mxu1 }
 0x8b0   :  { %v1268_v51 = vpop.f32.mrb[30].mxu1 }
 0x8b1   :  { %v1274_v24 = vmul.f32 0.044715, %v1266_v49  ;;  %v1269_v52 = vadd.f32 %v2862_v48, %v1268_v51  ;;  %v3096_v53 = vpop.f32.mrb[31].mxu1  ;;  %v1272_v3 = vmul.f32 0.5, %v1266_v49 }
 0x8b2   :  { %v2867_v53 = vld [vmem:[%s3930_s4 + $0x8] ss:$0 sm:$0xff] }
 0x8b3   :  { %v1276_v54 = vmul.f32 %v1274_v24, %v1266_v49  ;;  %v1275_v55 = vmul.f32 0.044715, %v1269_v52  ;;  %v1273_v4 = vmul.f32 0.5, %v1269_v52 }
 0x8b5   :  { %v1278_v56 = vmul.f32 %v1276_v54, %v1266_v49  ;;  %v1277_v57 = vmul.f32 %v1275_v55, %v1269_v52 }
 0x8b7   :  { %v1280_v58 = vadd.f32 %v1278_v56, %v1266_v49  ;;  %v1279_v60 = vmul.f32 %v1277_v57, %v1269_v52  ;;  %v2866_v49 = vld [vmem:[%s3930_s4 + $0x7] ss:$0 sm:$0xff] }
 0x8b9   :  { %v1282_v61 = vmul.f32 0.7978846, %v1280_v58  ;;  %v1281_v62 = vadd.f32 %v1279_v60, %v1269_v52  ;;  %v1397_v60 = vld [vmem:[#allocation2 + $0xf0] sm:$0xff] }
 0x8bb   :  { %3337 = vtanh.f32 %v1282_v61  ;;  %v1283_v63 = vmul.f32 0.7978846, %v1281_v62  ;;  %v1398_v61 = vld [vmem:[#allocation2 + $0xf8] sm:$0xff]  ;;  %v1485_v62 = vld [vmem:[#allocation2 + $0x100] sm:$0xff] }
 0x8bd   :  { %3339 = vtanh.f32 %v1283_v63  ;;  %v1486_v63 = vld [vmem:[#allocation2 + $0x108] sm:$0xff] }
 0x8c5   :  { %v3338_v0 = vpop.eup %3337 }
 0x8c6   :  { %v1286_v1 = vadd.f32 1.0, %v3338_v0  ;;  %v1400_v0 = vpack.c.bf16 %v1398_v61, %v1397_v60 }
 0x8c7   :  { %v3340_v2 = vpop.eup %3339 }
 0x8c8   :  { %v1287_v5 = vadd.f32 1.0, %v3340_v2  ;;  %v1288_v6 = vmul.f32 %v1286_v1, %v1272_v3  ;;  %v1489_v1 = vpack.c.bf16 %v1486_v63, %v1485_v62  ;;  %v1487_v2 = vld [vmem:[#allocation2 + $0x110] sm:$0xff]  ;;  %v1488_v3 = vld [vmem:[#allocation2 + $0x118] sm:$0xff] }
 0x8ca   :  { %v1289_v7 = vmul.f32 %v1287_v5, %v1273_v4  ;;  %v1490_v4 = vpack.c.bf16 %v1488_v3, %v1487_v2  ;;  %v1571_v5 = vld [vmem:[#allocation2 + $0x120] sm:$0xff] }
 0x8cc   :  { %v1298_v23 = vpack.c.bf16 %v1289_v7, %v1288_v6  ;;  %v1572_v6 = vld [vmem:[#allocation2 + $0x128] sm:$0xff] }
 0x8cd   :  { %v1575_v7 = vpack.c.bf16 %v1572_v6, %v1571_v5  ;;  %v3391_v6 = vld [vmem:[%s3927_s1] sm:$0xff] }
 0x8ce   :  { %3106 = vmatmul.mubr.msk.bf16.vlgmr.msra.gmra.mrb[32].mxu0 %vm1308_vm5, %v1298_v23  ;;  %v1573_v23 = vld [vmem:[#allocation2 + $0x130] sm:$0xff] }
 0x8cf   :  { %3123 = vmatprep.mubr.msk.bf16.mxu0 %vm41_vm0, %v1575_v7 }
 0x9a1   :  { %v1346_v43 = vpop.f32.mrb[32].mxu0 }
 0x9a2   :  { %v1347_v9 = vadd.f32 %v2864_v8, %v1346_v43  ;;  %v3107_v44 = vpop.f32.mrb[33].mxu0 }
 0x9a3   :  { %v1349_v10 = vpop.f32.mrb[34].mxu0 }
 0x9a4   :  { %v1350_v11 = vadd.f32 %v2864_v8, %v1349_v10  ;;  %v3108_v12 = vpop.f32.mrb[35].mxu0  ;;  %v1353_v13 = vadd.f32 %v1347_v9, %v1214_v32  ;;  %v2868_v32 = vld [vmem:[%s3929_s3 + $0x60] sm:$0xff]  ;;  %v1574_v8 = vld [vmem:[#allocation2 + $0x138] sm:$0xff] }
 0x9a5   :  { %v1576_v43 = vpack.c.bf16 %v1574_v8, %v1573_v23 }
 0x9a6   :  { %v1357_v14 = vsel %vm41_vm0, %v1353_v13, 0.0  ;;  %v1354_v15 = vadd.f32 %v1350_v11, %v1215_v33  ;;  %v2870_v33 = vld [vmem:[%s3929_s3 + $0x70] sm:$0xff] }
 0x9a7   :  { %1358 = vadd.xlane.f32.xlu0 %v1357_v14 }
 0x9a8   :  { %v1360_v16 = vsel %vm41_vm0, %v1354_v15, 0.0 }
 0x9a9   :  { %1361 = vadd.xlane.f32.xlu1 %v1360_v16 }
 0xa34   :  { %v1359_v17 = vpop.xlane.xlu0 %1358 }
 0xa35   :  { %v1363_v18 = vmul.f32 0.03125, %v1359_v17 }
 0xa36   :  { %v1362_v19 = vpop.xlane.xlu1 %1361 }
 0xa37   :  { %v1365_v20 = vsub.f32 %v1353_v13, %v1363_v18  ;;  %v1364_v21 = vmul.f32 0.03125, %v1362_v19 }
 0xa39   :  { %v1366_v26 = vsub.f32 %v1354_v15, %v1364_v21  ;;  %v1367_v27 = vmul.f32 %v1365_v20, %v1365_v20 }
 0xa3b   :  { %v1369_v28 = vsel %vm41_vm0, %v1367_v27, 0.0  ;;  %v1368_v29 = vmul.f32 %v1366_v26, %v1366_v26 }
 0xa3c   :  { %1370 = vadd.xlane.f32.xlu0 %v1369_v28 }
 0xa3d   :  { %v1372_v30 = vsel %vm41_vm0, %v1368_v29, 0.0 }
 0xa3e   :  { %1373 = vadd.xlane.f32.xlu1 %v1372_v30 }
 0xa4f   :  { %1414 = vperm.xlu1 %3248, %v2869_v31  }
 0xa52   :  { %1409 = vperm.xlu0 %3247, %v2868_v32  }
 0xa53   :  { %1419 = vperm.xlu1 %3248, %v2870_v33  }
 0xa56   :  { %1424 = vperm.xlu0 %3247, %v2871_v34  }
 0xa57   :  { %1498 = vperm.xlu1 %3248, %v2874_v35  }
 0xa5a   :  { %1503 = vperm.xlu0 %3247, %v2875_v36  }
 0xa5b   :  { %1508 = vperm.xlu1 %3248, %v2876_v37  }
 0xa5e   :  { %1513 = vperm.xlu0 %3247, %v2877_v38  }
 0xac9   :  { %v1371_v41 = vpop.xlane.xlu0 %1370 }
 0xaca   :  { %v1375_v42 = vmul.f32 0.03125, %v1371_v41 }
 0xacb   :  { %v1374_v45 = vpop.xlane.xlu1 %1373 }
 0xacc   :  { %v1377_v46 = vadd.f32 1e-12, %v1375_v42  ;;  %v1376_v47 = vmul.f32 0.03125, %v1374_v45 }
 0xace   :  { %3341 = vrsqrt.f32 %v1377_v46  ;;  %v1378_v48 = vadd.f32 1e-12, %v1376_v47 }
 0xacf   :  { %v1415_v9 = vpop.permute.xlu1 %1414 }
 0xad0   :  { %3343 = vrsqrt.f32 %v1378_v48 }
 0xad1   :  { %v1410_v44 = vpop.permute.xlu0 %1409 }
 0xad3   :  { %v1420_v11 = vpop.permute.xlu1 %1419 }
 0xad5   :  { %v1425_v13 = vpop.permute.xlu0 %1424 }
 0xad7   :  { %v1499_v27 = vpop.permute.xlu1 %1498 }
 0xad8   :  { %v3342_v25 = vpop.eup %3341 }
 0xad9   :  { %v1381_v50 = vmul.f32 %v3342_v25, %v1365_v20  ;;  %v1504_v31 = vpop.permute.xlu0 %1503 }
 0xada   :  { %v3344_v51 = vpop.eup %3343 }
 0xadb   :  { %v1382_v24 = vmul.f32 %v3344_v51, %v1366_v26  ;;  %v1387_v52 = vmul.f32 %v2866_v49, %v1381_v50  ;;  %v1509_v42 = vpop.permute.xlu1 %1508 }
 0xadd   :  { %v1388_v54 = vmul.f32 %v2866_v49, %v1382_v24  ;;  %v3719_v55 = vadd.f32 %v2867_v53, %v1387_v52  ;;  %v1514_v41 = vpop.permute.xlu0 %1513 }
 0xadf   :  { %v3721_v56 = vadd.f32 %v2867_v53, %v1388_v54 }
 0xae1   :  { %v1401_v57 = vpack.c.bf16 %v3721_v56, %v3719_v55 }
 0xae3   :  { %3238 = vmatprep.subr.msk.bf16.mxu1 %vm41_vm0, %v1401_v57  ;;  %3240 = vmatprep.subr.msk.bf16.mxu0 %vm41_vm0, %v1401_v57  ;;  %v1434_v58 = vsel %vm41_vm0, %v1401_v57, 0 }
 0xae4   :  { %3110 = vmatpush3.bf16.xpose.msra.mxu1 %v1434_v58  ;;  %3122 = vmatpush3.bf16.xpose.msra.mxu0 %v1434_v58 }
 0xae5   :  { %3239 = vmatprep.subr.msk.bf16.mxu1 %vm41_vm0, %v1401_v57  ;;  %3133 = vmatprep.subr.bf16.mxu0 %v3421_v59 }
 0xaeb   :  { %3112 = vmatmul.mubr.msk.bf16.vlgmr.msra.gmra.mrb[32].mxu1 %vm41_vm0, %v1400_v0  ;;  %3124 = vmatmul.mubr.msk.bf16.vlgmr.msra.gmra.mrb[36].mxu0 %vm41_vm0, %v1576_v43 }
 0xaec   :  { %3116 = vmatpush3.bf16.xpose.msra.mxu1 %v1434_v58  ;;  %3117 = vmatprep.mubr.msk.bf16.mxu1 %vm41_vm0, %v1489_v1 }
 0xaed   :  { %3127 = vmatprep.subr.bf16.mxu1 %v3421_v59  ;;  %3135 = vmatprep.mubr.msk.bf16.mxu0 %vm3422_vm2, %v3421_v59 }
 0xaf3   :  { %3118 = vmatmul.mubr.msk.bf16.vlgmr.msra.gmra.mrb[36].mxu1 %vm41_vm0, %v1490_v4 }
 0xaf4   :  { %3129 = vmatprep.mubr.msk.bf16.mxu1 %vm3422_vm2, %v3421_v59 }
 0xbbe   :  { %v3113_v10 = vpop.f32.mrb[32].mxu1  ;;  %v3744_v38 = vpop.f32.mrb[36].mxu0 }
 0xbbf   :  { %v1470_v12 = vpop.f32.mrb[33].mxu1  ;;  %v1479_v15 = vadd.f32 %v3113_v10, %v1420_v11  ;;  %v3746_v22 = vpop.f32.mrb[37].mxu0  ;;  %v3392_v10 = vld [vmem:[%s3927_s1 + $0x8] sm:$0xff] }
 0xbc0   :  { %v3114_v14 = vpop.f32.mrb[34].mxu1  ;;  %v1471_v18 = vadd.f32 %v1470_v12, %v1410_v44  ;;  %v3748_v39 = vpop.f32.mrb[38].mxu0 }
 0xbc1   :  { %v1482_v16 = vadd.f32 %v3114_v14, %v1425_v13  ;;  %v1473_v17 = vpop.f32.mrb[35].mxu1  ;;  %v3750_v40 = vpop.f32.mrb[39].mxu0 }
 0xbc2   :  { %v1474_v19 = vadd.f32 %v1473_v17, %v1415_v9 }
 0xbc3   :  { %v3285_v20 = vpack.i.bf16 %v1482_v16, %v1479_v15 }
 0xbc4   :  { %v3273_v21 = vpack.i.bf16 %v1474_v19, %v1471_v18 }
 0xbc5   :  { %3286 = vxpose.xlu0.b32.start.end [1/1] (short) (narrow) %v3285_v20, 16 }
 0xbc6   :  { %v3119_v26 = vpop.f32.mrb[36].mxu1  ;;  %3274 = vxpose.xlu1.b32.start.end [1/1] (short) (narrow) %v3273_v21, 16 }
 0xbc7   :  { %v1556_v28 = vpop.f32.mrb[37].mxu1  ;;  %v1565_v45 = vadd.f32 %v3119_v26, %v1509_v42  ;;  %v2880_v42 = vld [vmem:[%s3929_s3 + $0xa0] sm:$0xff] }
 0xbc8   :  { %v1557_v29 = vadd.f32 %v1556_v28, %v1499_v27  ;;  %v3120_v30 = vpop.f32.mrb[38].mxu1 }
 0xbc9   :  { %v1559_v32 = vpop.f32.mrb[39].mxu1  ;;  %v1568_v46 = vadd.f32 %v3120_v30, %v1514_v41  ;;  %v1791_v25 = vpack.c.bf16 %v1565_v45, %v1565_v45 }
 0xbca   :  { %v1789_v33 = vpack.c.bf16 %v1557_v29, %v1557_v29  ;;  %v1560_v34 = vadd.f32 %v1559_v32, %v1504_v31 }
 0xbcb   :  { %v1792_v49 = vpack.c.bf16 %v1568_v46, %v1568_v46  ;;  %v1891_v60 = vsel %vm482_vm1, %v1791_v25, 0 }
 0xbcc   :  { %v1797_v35 = vsel %vm482_vm1, %v1789_v33, 0  ;;  %v1790_v36 = vpack.c.bf16 %v1560_v34, %v1560_v34 }
 0xbcd   :  { %3128 = vmatpush3.bf16.msra.mxu1 %v1797_v35  ;;  %v1938_v61 = vsel %vm482_vm1, %v1792_v49, 0 }
 0xbce   :  { %v1844_v37 = vsel %vm482_vm1, %v1790_v36, 0  ;;  %3139 = vmatprep.subr.bf16.mxu1 %v3421_v59 }
 0xbcf   :  { %3134 = vmatpush3.bf16.msra.mxu0 %v1844_v37 }
 0xbd0   :  { %3145 = vmatprep.subr.bf16.mxu0 %v3421_v59 }
 0xc45   :  { %v3287_v47 = vpop.trf.xlu0 }
 0xc46   :  { %v3275_v48 = vpop.trf.xlu1  ;;  %v3291_v62 = vunpack.i.h.bf16 %v3287_v47  ;;  %v3288_v63 = vunpack.i.l.bf16 %v3287_v47 }
 0xc47   :  { %v3279_v51 = vunpack.i.h.bf16 %v3275_v48  ;;  %v3276_v24 = vunpack.i.l.bf16 %v3275_v48 }
 0xc49   :  { %v3292_v50 = vpop.trf.xlu0 }
 0xc4a   :  { %v3280_v52 = vpop.trf.xlu1  ;;  %v3296_v0 = vunpack.i.h.bf16 %v3292_v50  ;;  %v3293_v1 = vunpack.i.l.bf16 %v3292_v50 }
 0xc4b   :  { %v3284_v53 = vunpack.i.h.bf16 %v3280_v52  ;;  %v3281_v54 = vunpack.i.l.bf16 %v3280_v52 }
 0xc4c   :  { %v1787_v2 = vpack.c.bf16 %v3293_v1, %v3288_v63  ;;  %v1788_v3 = vpack.c.bf16 %v3296_v0, %v3291_v62 }
 0xc4d   :  { %v1785_v57 = vpack.c.bf16 %v3281_v54, %v3276_v24  ;;  %v1786_v58 = vpack.c.bf16 %v3284_v53, %v3279_v51 }
 0xc4f   :  { %3130 = vmatmul.mubr.msk.bf16.vlgmr.msra.gmra.mrb[40].mxu1 %vm478_vm3, %v1785_v57  ;;  %3136 = vmatmul.mubr.msk.bf16.vlgmr.msra.gmra.mrb[40].mxu0 %vm478_vm3, %v1786_v58 }
 0xc50   :  { %3140 = vmatpush3.bf16.msra.mxu1 %v1891_v60  ;;  %3146 = vmatpush3.bf16.msra.mxu0 %v1938_v61 }
 0xc51   :  { %3141 = vmatprep.mubr.msk.bf16.mxu1 %vm3422_vm2, %v3421_v59  ;;  %3147 = vmatprep.mubr.msk.bf16.mxu0 %vm3422_vm2, %v3421_v59 }
 0xc52   :  { %3151 = vmatprep.subr.bf16.mxu1 %v3421_v59  ;;  %3157 = vmatprep.subr.bf16.mxu0 %v3421_v59 }
 0xc57   :  { %3142 = vmatmul.mubr.msk.bf16.vlgmr.msra.gmra.mrb[44].mxu1 %vm478_vm3, %v1787_v2  ;;  %3148 = vmatmul.mubr.msk.bf16.vlgmr.msra.gmra.mrb[44].mxu0 %vm478_vm3, %v1788_v3 }
 0xc58   :  { %3153 = vmatprep.mubr.msk.bf16.mxu1 %vm3422_vm2, %v3421_v59  ;;  %3159 = vmatprep.mubr.msk.bf16.mxu0 %vm3422_vm2, %v3421_v59 }
 0xd22   :  { %v1833_v4 = vpop.f32.mrb[40].mxu1  ;;  %v1880_v5 = vpop.f32.mrb[40].mxu0 }
 0xd23   :  { %v1834_v7 = vadd.f32 %v3391_v6, %v1833_v4  ;;  %v3131_v23 = vpop.f32.mrb[41].mxu1  ;;  %v3137_v8 = vpop.f32.mrb[41].mxu0  ;;  %v1881_v44 = vadd.f32 %v3391_v6, %v1880_v5 }
 0xd24   :  { %v1836_v43 = vpop.f32.mrb[42].mxu1  ;;  %v1883_v9 = vpop.f32.mrb[42].mxu0 }
 0xd25   :  { %v1837_v11 = vadd.f32 %v3392_v10, %v1836_v43  ;;  %v3132_v12 = vpop.f32.mrb[43].mxu1  ;;  %v3138_v13 = vpop.f32.mrb[43].mxu0  ;;  %v1981_v14 = vsel %vm668_vm4, %v1834_v7, -inf  ;;  %v1884_v15 = vadd.f32 %v3392_v10, %v1883_v9  ;;  %v1987_v17 = vsel %vm668_vm4, %v1881_v44, -inf }
 0xd26   :  { %1982 = vmax.xlane.f32.xlu0 %v1981_v14 }
 0xd27   :  { %v1984_v16 = vsel %vm668_vm4, %v1837_v11, -inf  ;;  %v1990_v27 = vsel %vm668_vm4, %v1884_v15, -inf }
 0xd28   :  { %1985 = vmax.xlane.f32.xlu1 %v1984_v16 }
 0xd2a   :  { %v1974_v18 = vpop.f32.mrb[44].mxu0  ;;  %1988 = vmax.xlane.f32.xlu0 %v1987_v17  ;;  %v1927_v19 = vpop.f32.mrb[44].mxu1 }
 0xd2b   :  { %v1928_v20 = vadd.f32 %v3391_v6, %v1927_v19  ;;  %v3143_v21 = vpop.f32.mrb[45].mxu1  ;;  %v3149_v26 = vpop.f32.mrb[45].mxu0  ;;  %v1975_v30 = vadd.f32 %v3391_v6, %v1974_v18 }
 0xd2c   :  { %v1977_v28 = vpop.f32.mrb[46].mxu0  ;;  %1991 = vmax.xlane.f32.xlu1 %v1990_v27  ;;  %v1930_v29 = vpop.f32.mrb[46].mxu1  ;;  %v2882_v26 = vld [vmem:[%s3929_s3 + $0xb0] sm:$0xff]  ;;  %v2883_v27 = vld [vmem:[%s3929_s3 + $0xb8] sm:$0xff] }
 0xd2d   :  { %v1931_v31 = vadd.f32 %v3392_v10, %v1930_v29  ;;  %v3144_v32 = vpop.f32.mrb[47].mxu1  ;;  %v3150_v33 = vpop.f32.mrb[47].mxu0  ;;  %v1993_v34 = vsel %vm668_vm4, %v1928_v20, -inf  ;;  %v1978_v35 = vadd.f32 %v3392_v10, %v1977_v28  ;;  %v1999_v37 = vsel %vm668_vm4, %v1975_v30, -inf  ;;  %v2881_v28 = vld [vmem:[%s3929_s3 + $0xa8] sm:$0xff] }
 0xd2e   :  { %1994 = vmax.xlane.f32.xlu0 %v1993_v34 }
 0xd2f   :  { %v1996_v36 = vsel %vm668_vm4, %v1931_v31, -inf  ;;  %v2002_v41 = vsel %vm668_vm4, %v1978_v35, -inf }
 0xd30   :  { %1997 = vmax.xlane.f32.xlu1 %v1996_v36 }
 0xd32   :  { %2000 = vmax.xlane.f32.xlu0 %v1999_v37 }
 0xd34   :  { %2003 = vmax.xlane.f32.xlu1 %v2002_v41 }
 0xd48   :  { %1584 = vperm.xlu0 %3247, %v2880_v42  }
 0xdb3   :  { %v1983_v45 = vpop.xlane.xlu0 %1982 }
 0xdb4   :  { %v2005_v46 = vsub.f32 %v1834_v7, %v1983_v45 }
 0xdb5   :  { %v1986_v47 = vpop.xlane.xlu1 %1985 }
 0xdb6   :  { %v2013_v48 = vmul.f32 1.442695, %v2005_v46  ;;  %v2006_v25 = vsub.f32 %v1837_v11, %v1986_v47 }
 0xdb7   :  { %v1989_v49 = vpop.xlane.xlu0 %1988 }
 0xdb8   :  { %3345 = vpow2.f32 %v2013_v48  ;;  %v2015_v50 = vmul.f32 1.442695, %v2006_v25  ;;  %v2007_v51 = vsub.f32 %v1881_v44, %v1989_v49 }
 0xdb9   :  { %v1992_v24 = vpop.xlane.xlu1 %1991 }
 0xdba   :  { %3347 = vpow2.f32 %v2015_v50  ;;  %v2017_v52 = vmul.f32 1.442695, %v2007_v51  ;;  %v2008_v53 = vsub.f32 %v1884_v15, %v1992_v24 }
 0xdbb   :  { %v1995_v54 = vpop.xlane.xlu0 %1994 }
 0xdbc   :  { %3349 = vpow2.f32 %v2017_v52  ;;  %v2019_v57 = vmul.f32 1.442695, %v2008_v53  ;;  %v2009_v58 = vsub.f32 %v1928_v20, %v1995_v54 }
 0xdbd   :  { %v1998_v60 = vpop.xlane.xlu1 %1997 }
 0xdbe   :  { %3351 = vpow2.f32 %v2019_v57  ;;  %v2021_v61 = vmul.f32 1.442695, %v2009_v58  ;;  %v2010_v62 = vsub.f32 %v1931_v31, %v1998_v60 }
 0xdbf   :  { %v2001_v63 = vpop.xlane.xlu0 %2000 }
 0xdc0   :  { %3353 = vpow2.f32 %v2021_v61  ;;  %v2023_v0 = vmul.f32 1.442695, %v2010_v62  ;;  %v2011_v1 = vsub.f32 %v1975_v30, %v2001_v63 }
 0xdc1   :  { %v2004_v2 = vpop.xlane.xlu1 %2003 }
 0xdc2   :  { %v3346_v3 = vpop.eup %3345  ;;  %3355 = vpow2.f32 %v2023_v0  ;;  %v2025_v4 = vmul.f32 1.442695, %v2011_v1  ;;  %v2012_v5 = vsub.f32 %v1978_v35, %v2004_v2 }
 0xdc3   :  { %v2029_v6 = vsel %vm668_vm4, %v3346_v3, 0.0 }
 0xdc4   :  { %v3348_v7 = vpop.eup %3347  ;;  %3357 = vpow2.f32 %v2025_v4  ;;  %v2027_v23 = vmul.f32 1.442695, %v2012_v5  ;;  %2030 = vadd.xlane.f32.xlu0 %v2029_v6 }
 0xdc5   :  { %v2032_v8 = vsel %vm668_vm4, %v3348_v7, 0.0 }
 0xdc6   :  { %v3787_v43 = vpop.eup %3349  ;;  %2033 = vadd.xlane.f32.xlu1 %v2032_v8  ;;  %3359 = vpow2.f32 %v2027_v23  ;;  %v2265_v23 = vld [vmem:[#allocation2 + $0x140] sm:$0xff] }
 0xdc7   :  { %v1585_v9 = vpop.permute.xlu0 %1584  ;;  %v2035_v44 = vsel %vm668_vm4, %v3787_v43, 0.0  ;;  %v2273_v8 = vpack.c.bf16 %v2265_v23, %v2265_v23 }
 0xdc8   :  { %v3791_v10 = vpop.eup %3351  ;;  %v1643_v11 = vadd.f32 %v3746_v22, %v1585_v9  ;;  %2036 = vadd.xlane.f32.xlu0 %v2035_v44  ;;  %v2266_v9 = vld [vmem:[#allocation2 + $0x148] sm:$0xff] }
 0xdc9   :  { %v2038_v12 = vsel %vm668_vm4, %v3791_v10, 0.0  ;;  %v2274_v44 = vpack.c.bf16 %v2266_v9, %v2266_v9 }
 0xdca   :  { %v3354_v13 = vpop.eup %3353  ;;  %v2073_v14 = vpack.c.bf16 %v1643_v11, %v1643_v11  ;;  %2039 = vadd.xlane.f32.xlu1 %v2038_v12  ;;  %v2267_v11 = vld [vmem:[#allocation2 + $0x150] sm:$0xff] }
 0xdcb   :  { %v2041_v15 = vsel %vm668_vm4, %v3354_v13, 0.0  ;;  %v2275_v12 = vpack.c.bf16 %v2267_v11, %v2267_v11 }
 0xdcc   :  { %v3356_v16 = vpop.eup %3355  ;;  %v2081_v17 = vsel %vm668_vm4, %v2073_v14, 0  ;;  %2042 = vadd.xlane.f32.xlu0 %v2041_v15 }
 0xdcd   :  { %3152 = vmatpush3.bf16.xpose.msra.mxu1 %v2081_v17  ;;  %v2044_v18 = vsel %vm668_vm4, %v3356_v16, 0.0 }
 0xdce   :  { %v3799_v19 = vpop.eup %3357  ;;  %2045 = vadd.xlane.f32.xlu1 %v2044_v18  ;;  %3163 = vmatprep.subr.bf16.mxu1 %v3421_v59  ;;  %v2375_v18 = vsel %vm482_vm1, %v2275_v12, 0 }
 0xdcf   :  { %v2047_v22 = vsel %vm668_vm4, %v3799_v19, 0.0 }
 0xdd0   :  { %v3804_v20 = vpop.eup %3359 }
 0xdd1   :  { %v2050_v21 = vsel %vm668_vm4, %v3804_v20, 0.0 }
 0xdd2   :  { %2048 = vadd.xlane.f32.xlu1 %v2047_v22 }
 0xdd6   :  { %2051 = vadd.xlane.f32.xlu1 %v2050_v21  ;;  %v2268_v21 = vld [vmem:[#allocation2 + $0x158] sm:$0xff] }
 0xde2   :  { %1594 = vperm.xlu0 %3247, %v2882_v26  }
 0xde6   :  { %1599 = vperm.xlu0 %3247, %v2883_v27  }
 0xde7   :  { %1589 = vperm.xlu1 %3248, %v2881_v28   ;;  %v2276_v28 = vpack.c.bf16 %v2268_v21, %v2268_v21  ;;  %v2528_v21 = vld [vmem:[#allocation2 + $0x160] sm:$0xff] }
 0xe51   :  { %v2031_v29 = vpop.xlane.xlu0 %2030 }
 0xe52   :  { %3361 = vrcp.f32 %v2031_v29 }
 0xe53   :  { %v2034_v30 = vpop.xlane.xlu1 %2033 }
 0xe54   :  { %3363 = vrcp.f32 %v2034_v30 }
 0xe55   :  { %v2037_v31 = vpop.xlane.xlu0 %2036 }
 0xe57   :  { %v2040_v32 = vpop.xlane.xlu1 %2039 }
 0xe59   :  { %v2043_v33 = vpop.xlane.xlu0 %2042 }
 0xe5b   :  { %v2046_v34 = vpop.xlane.xlu1 %2045 }
 0xe5c   :  { %v3362_v35 = vpop.eup %3361  ;;  %3365 = vrcp.f32 %v2046_v34  ;;  %v2422_v34 = vsel %vm482_vm1, %v2276_v28, 0  ;;  %v2531_v28 = vld [vmem:[#allocation2 + $0x178] sm:$0xff] }
 0xe5d   :  { %3367 = vrcp.f32 %v2043_v33  ;;  %v2061_v37 = vmul.f32 %v3362_v35, %v3346_v3 }
 0xe5e   :  { %v3364_v36 = vpop.eup %3363  ;;  %3369 = vrcp.f32 %v2040_v32 }
 0xe5f   :  { %v2062_v41 = vmul.f32 %v3364_v36, %v3348_v7  ;;  %v2049_v42 = vpop.xlane.xlu1 %2048  ;;  %3371 = vrcp.f32 %v2037_v31 }
 0xe61   :  { %v1595_v45 = vpop.permute.xlu0 %1594  ;;  %v2069_v46 = vpack.c.bf16 %v2062_v41, %v2061_v37 }
 0xe62   :  { %v1651_v47 = vadd.f32 %v3744_v38, %v1595_v45 }
 0xe63   :  { %3154 = vmatmul.mubr.msk.bf16.vlgmr.msra.gmra.mrb[48].mxu1 %vm668_vm4, %v2069_v46  ;;  %v2052_v48 = vpop.xlane.xlu1 %2051 }
 0xe64   :  { %v2075_v25 = vpack.c.bf16 %v1651_v47, %v1651_v47  ;;  %3165 = vmatprep.mubr.msk.bf16.mxu1 %vm3422_vm2, %v3421_v59  ;;  %3373 = vrcp.f32 %v2052_v48 }
 0xe65   :  { %v1600_v38 = vpop.permute.xlu0 %1599  ;;  %3375 = vrcp.f32 %v2049_v42 }
 0xe66   :  { %v3366_v49 = vpop.eup %3365  ;;  %v2175_v50 = vsel %vm668_vm4, %v2075_v25, 0  ;;  %v1654_v60 = vadd.f32 %v3748_v39, %v1600_v38 }
 0xe67   :  { %v3368_v51 = vpop.eup %3367  ;;  %3164 = vmatpush3.bf16.xpose.msra.mxu1 %v2175_v50  ;;  %v1590_v24 = vpop.permute.xlu1 %1589  ;;  %v2066_v52 = vmul.f32 %v3366_v49, %v3356_v16 }
 0xe68   :  { %v1646_v53 = vadd.f32 %v3750_v40, %v1590_v24  ;;  %3175 = vmatprep.subr.bf16.mxu1 %v3421_v59  ;;  %v2065_v54 = vmul.f32 %v3368_v51, %v3354_v13  ;;  %v3370_v58 = vpop.eup %3369  ;;  %v2076_v1 = vpack.c.bf16 %v1654_v60, %v1654_v60 }
 0xe69   :  { %v3372_v63 = vpop.eup %3371  ;;  %v2064_v0 = vmul.f32 %v3370_v58, %v3791_v10  ;;  %v2328_v10 = vsel %vm482_vm1, %v2274_v44, 0 }
 0xe6a   :  { %v2074_v57 = vpack.c.bf16 %v1646_v53, %v1646_v53  ;;  %v2071_v62 = vpack.c.bf16 %v2066_v52, %v2065_v54  ;;  %v2063_v40 = vmul.f32 %v3372_v63, %v3787_v43  ;;  %v2222_v39 = vsel %vm668_vm4, %v2076_v1, 0 }
 0xe6b   :  { %v2281_v43 = vsel %vm482_vm1, %v2273_v8, 0 }
 0xe6c   :  { %v2128_v61 = vsel %vm668_vm4, %v2074_v57, 0  ;;  %v2070_v2 = vpack.c.bf16 %v2064_v0, %v2063_v40 }
 0xe6d   :  { %3158 = vmatpush3.bf16.xpose.msra.mxu0 %v2128_v61 }
 0xe6e   :  { %3166 = vmatmul.mubr.msk.bf16.vlgmr.msra.gmra.mrb[52].mxu1 %vm668_vm4, %v2071_v62  ;;  %3169 = vmatprep.subr.bf16.mxu0 %v3421_v59  ;;  %v3374_v3 = vpop.eup %3373 }
 0xe6f   :  { %3177 = vmatprep.mubr.msk.bf16.mxu1 %vm3422_vm2, %v3421_v59  ;;  %v3376_v4 = vpop.eup %3375  ;;  %v2068_v5 = vmul.f32 %v3374_v3, %v3804_v20  ;;  %3176 = vmatpush3.bf16.msra.mxu1 %v2281_v43 }
 0xe70   :  { %v2067_v6 = vmul.f32 %v3376_v4, %v3799_v19  ;;  %3187 = vmatprep.subr.bf16.mxu1 %v3421_v59 }
 0xe72   :  { %v2072_v7 = vpack.c.bf16 %v2068_v5, %v2067_v6 }
 0xe74   :  { %3160 = vmatmul.mubr.msk.bf16.vlgmr.msra.gmra.mrb[48].mxu0 %vm668_vm4, %v2070_v2 }
 0xe75   :  { %3170 = vmatpush3.bf16.xpose.msra.mxu0 %v2222_v39  ;;  %3171 = vmatprep.mubr.msk.bf16.mxu0 %vm3422_vm2, %v3421_v59  ;;  %v2898_v39 = vld [vmem:[%s3930_s4 + $0x9] ss:$0 sm:$0xff] }
 0xe76   :  { %3181 = vmatprep.subr.bf16.mxu0 %v3421_v59 }
 0xe7c   :  { %3172 = vmatmul.mubr.msk.bf16.vlgmr.msra.gmra.mrb[52].mxu0 %vm668_vm4, %v2072_v7 }
 0xe7d   :  { %3183 = vmatprep.mubr.msk.bf16.mxu0 %vm3422_vm2, %v3421_v59  ;;  %3182 = vmatpush3.bf16.msra.mxu0 %v2328_v10 }
 0xe7e   :  { %3193 = vmatprep.subr.bf16.mxu0 %v3421_v59 }
 0xf36   :  { %v2117_v13 = vpop.f32.mrb[48].mxu1 }
 0xf37   :  { %v3155_v14 = vpop.f32.mrb[49].mxu1 }
 0xf38   :  { %v2120_v15 = vpop.f32.mrb[50].mxu1 }
 0xf39   :  { %v2269_v16 = vpack.c.bf16 %v2120_v15, %v2117_v13  ;;  %v3156_v17 = vpop.f32.mrb[51].mxu1 }
 0xf3b   :  { %3178 = vmatmul.mubr.msk.bf16.vlgmr.msra.gmra.mrb[56].mxu1 %vm478_vm3, %v2269_v16 }
 0xf3c   :  { %3188 = vmatpush3.bf16.msra.mxu1 %v2375_v18  ;;  %3189 = vmatprep.mubr.msk.bf16.mxu1 %vm3422_vm2, %v3421_v59 }
 0xf3d   :  { %3199 = vmatprep.subr.bf16.mxu1 %v3421_v59 }
 0xf41   :  { %v2211_v19 = vpop.f32.mrb[52].mxu1 }
 0xf42   :  { %v3167_v22 = vpop.f32.mrb[53].mxu1 }
 0xf43   :  { %v2214_v20 = vpop.f32.mrb[54].mxu1 }
 0xf44   :  { %v2271_v26 = vpack.c.bf16 %v2214_v20, %v2211_v19  ;;  %v3168_v27 = vpop.f32.mrb[55].mxu1 }
 0xf45   :  { %v2530_v27 = vld [vmem:[#allocation2 + $0x170] sm:$0xff] }
 0xf46   :  { %3190 = vmatmul.mubr.msk.bf16.vlgmr.msra.gmra.mrb[60].mxu1 %vm478_vm3, %v2271_v26 }
 0xf47   :  { %v2164_v29 = vpop.f32.mrb[48].mxu0  ;;  %3203 = vmatprep.mubr.msk.bf16.mxu1 %vm3422_vm2, %v3421_v59 }
 0xf48   :  { %v3161_v30 = vpop.f32.mrb[49].mxu0 }
 0xf49   :  { %v2167_v31 = vpop.f32.mrb[50].mxu0 }
 0xf4a   :  { %v2270_v32 = vpack.c.bf16 %v2167_v31, %v2164_v29  ;;  %v3162_v33 = vpop.f32.mrb[51].mxu0  ;;  %v2534_v29 = vpack.c.bf16 %v2531_v28, %v2530_v27 }
 0xf4c   :  { %3184 = vmatmul.mubr.msk.bf16.vlgmr.msra.gmra.mrb[56].mxu0 %vm478_vm3, %v2270_v32 }
 0xf4d   :  { %3194 = vmatpush3.bf16.msra.mxu0 %v2422_v34  ;;  %3195 = vmatprep.mubr.msk.bf16.mxu0 %vm3422_vm2, %v3421_v59 }
 0xf4e   :  { %3207 = vmatprep.subr.bf16.mxu0 %v3421_v59 }
 0xf4f   :  { %v2258_v35 = vpop.f32.mrb[52].mxu0 }
 0xf50   :  { %v3173_v36 = vpop.f32.mrb[53].mxu0 }
 0xf51   :  { %v2261_v37 = vpop.f32.mrb[54].mxu0 }
 0xf52   :  { %v2272_v41 = vpack.c.bf16 %v2261_v37, %v2258_v35  ;;  %v3174_v42 = vpop.f32.mrb[55].mxu0  ;;  %v2899_v37 = vld [vmem:[%s3930_s4 + $0xa] ss:$0 sm:$0xff] }
 0xf54   :  { %3196 = vmatmul.mubr.msk.bf16.vlgmr.msra.gmra.mrb[60].mxu0 %vm478_vm3, %v2272_v41 }
 0xf55   :  { %3215 = vmatprep.mubr.msk.bf16.mxu0 %vm3422_vm2, %v3421_v59 }
0x100e   :  { %v2317_v45 = vpop.f32.mrb[56].mxu1 }
0x100f   :  { %v3179_v46 = vpop.f32.mrb[57].mxu1  ;;  %v2465_v52 = vsel %vm41_vm0, %v2317_v45, 0.0 }
0x1010   :  { %v2320_v47 = vpop.f32.mrb[58].mxu1 }
0x1011   :  { %v3180_v48 = vpop.f32.mrb[59].mxu1  ;;  %v2472_v58 = vsel %vm41_vm0, %v2320_v47, 0.0  ;;  %v2900_v47 = vld [vmem:[%s3930_s4 + $0xb] ss:$0 sm:$0xff] }
0x1019   :  { %v2411_v25 = vpop.f32.mrb[60].mxu1 }
0x101a   :  { %v3191_v49 = vpop.f32.mrb[61].mxu1  ;;  %v2468_v60 = vsel %vm41_vm0, %v2411_v25, 0.0 }
0x101b   :  { %v2414_v50 = vpop.f32.mrb[62].mxu1 }
0x101c   :  { %v3192_v51 = vpop.f32.mrb[63].mxu1  ;;  %v2475_v40 = vsel %vm41_vm0, %v2414_v50, 0.0 }
0x101d   :  { %v2602_v51 = vld [vmem:[#allocation2 + $0x180] sm:$0xff] }
0x101f   :  { %v2364_v24 = vpop.f32.mrb[56].mxu0 }
0x1020   :  { %v2466_v53 = vsel %vm41_vm0, %v2364_v24, 0.0  ;;  %v3185_v38 = vpop.f32.mrb[57].mxu0  ;;  %v2603_v24 = vld [vmem:[#allocation2 + $0x188] sm:$0xff] }
0x1021   :  { %v2467_v54 = vadd.f32 %v2466_v53, %v2465_v52  ;;  %v2367_v57 = vpop.f32.mrb[58].mxu0  ;;  %v2604_v52 = vld [vmem:[#allocation2 + $0x190] sm:$0xff]  ;;  %v2611_v53 = vpack.c.bf16 %v2603_v24, %v2602_v51  ;;  %v2605_v38 = vld [vmem:[#allocation2 + $0x198] sm:$0xff] }
0x1022   :  { %v2473_v61 = vsel %vm41_vm0, %v2367_v57, 0.0  ;;  %v3186_v62 = vpop.f32.mrb[59].mxu0  ;;  %v2606_v57 = vld [vmem:[#allocation2 + $0x1a0] sm:$0xff]  ;;  %v2717_v51 = vld [vmem:[#allocation2 + $0x1d8] sm:$0xff] }
0x1023   :  { %v2474_v63 = vadd.f32 %v2473_v61, %v2472_v58  ;;  %v2469_v0 = vadd.f32 %v2468_v60, %v2467_v54  ;;  %3208 = vmatpush3.bf16.msra.mxu0 %v2611_v53  ;;  %v2612_v54 = vpack.c.bf16 %v2605_v38, %v2604_v52  ;;  %v2607_v58 = vld [vmem:[#allocation2 + $0x1a8] sm:$0xff]  ;;  %v2608_v61 = vld [vmem:[#allocation2 + $0x1b0] sm:$0xff]  ;;  %v2609_v62 = vld [vmem:[#allocation2 + $0x1b8] sm:$0xff] }
0x1024   :  { %3209 = vmatprep.subr.bf16.mxu0 %v3421_v59  ;;  %v2613_v60 = vpack.c.bf16 %v2607_v58, %v2606_v57 }
0x1025   :  { %v2476_v1 = vadd.f32 %v2475_v40, %v2474_v63  ;;  %v2614_v63 = vpack.c.bf16 %v2609_v62, %v2608_v61 }
0x1027   :  { %v2458_v2 = vpop.f32.mrb[60].mxu0  ;;  %3210 = vmatpush3.bf16.msra.mxu0 %v2612_v54 }
0x1028   :  { %v2470_v3 = vsel %vm41_vm0, %v2458_v2, 0.0  ;;  %v3197_v4 = vpop.f32.mrb[61].mxu0  ;;  %3211 = vmatprep.subr.bf16.mxu0 %v3421_v59 }
0x1029   :  { %v2471_v5 = vadd.f32 %v2470_v3, %v2469_v0  ;;  %v2461_v6 = vpop.f32.mrb[62].mxu0  ;;  %v2901_v0 = vld [vmem:[%s3930_s4 + $0xc] ss:$0 sm:$0xff] }
0x102a   :  { %v2477_v7 = vsel %vm41_vm0, %v2461_v6, 0.0  ;;  %v3198_v23 = vpop.f32.mrb[63].mxu0 }
0x102b   :  { %v2484_v8 = vadd.f32 %v2898_v39, %v2471_v5  ;;  %v2478_v43 = vadd.f32 %v2477_v7, %v2476_v1  ;;  %3212 = vmatpush3.bf16.msra.mxu0 %v2613_v60 }
0x102c   :  { %3213 = vmatprep.subr.bf16.mxu0 %v3421_v59 }
0x102d   :  { %v2485_v9 = vadd.f32 %v2898_v39, %v2478_v43  ;;  %v2486_v44 = vadd.f32 %v2484_v8, %v3719_v55 }
0x102f   :  { %v2490_v10 = vsel %vm41_vm0, %v2486_v44, 0.0  ;;  %v2487_v11 = vadd.f32 %v2485_v9, %v3721_v56  ;;  %v2529_v56 = vld [vmem:[#allocation2 + $0x168] sm:$0xff]  ;;  %3214 = vmatpush3.bf16.msra.mxu0 %v2614_v63 }
0x1030   :  { %2491 = vadd.xlane.f32.xlu1 %v2490_v10  ;;  %v2533_v26 = vpack.c.bf16 %v2529_v56, %v2528_v21  ;;  %v2905_v63 = vld [vmem:[%s3930_s4 + $0xe] ss:$0 sm:$0xff] }
0x1031   :  { %v2493_v12 = vsel %vm41_vm0, %v2487_v11, 0.0 }
0x1032   :  { %2494 = vadd.xlane.f32.xlu0 %v2493_v12  ;;  %3200 = vmatpush3.bf16.msra.mxu1 %v2533_v26 }
0x1033   :  { %3201 = vmatprep.subr.bf16.mxu1 %v3421_v59 }
0x1036   :  { %3202 = vmatpush3.bf16.msra.mxu1 %v2534_v29 }
0x1037   :  { %3219 = vmatprep.subr.bf16.mxu1 %v3421_v59 }
0x10bd   :  { %v2492_v13 = vpop.xlane.xlu1 %2491 }
0x10be   :  { %v2496_v14 = vmul.f32 0.03125, %v2492_v13 }
0x10bf   :  { %v2495_v15 = vpop.xlane.xlu0 %2494 }
0x10c0   :  { %v2498_v16 = vsub.f32 %v2486_v44, %v2496_v14  ;;  %v2497_v17 = vmul.f32 0.03125, %v2495_v15 }
0x10c2   :  { %v2499_v18 = vsub.f32 %v2487_v11, %v2497_v17  ;;  %v2500_v19 = vmul.f32 %v2498_v16, %v2498_v16 }
0x10c4   :  { %v2502_v22 = vsel %vm41_vm0, %v2500_v19, 0.0  ;;  %v2501_v20 = vmul.f32 %v2499_v18, %v2499_v18 }
0x10c5   :  { %2503 = vadd.xlane.f32.xlu0 %v2502_v22 }
0x10c6   :  { %v2505_v55 = vsel %vm41_vm0, %v2501_v20, 0.0  ;;  %v2903_v20 = vld [vmem:[%s3930_s4 + $0xd] ss:$0 sm:$0xff] }
0x10c7   :  { %2506 = vadd.xlane.f32.xlu1 %v2505_v55 }
0x1152   :  { %v2504_v30 = vpop.xlane.xlu0 %2503 }
0x1153   :  { %v2508_v31 = vmul.f32 0.03125, %v2504_v30 }
0x1154   :  { %v2507_v32 = vpop.xlane.xlu1 %2506 }
0x1155   :  { %v2510_v33 = vadd.f32 1e-12, %v2508_v31  ;;  %v2509_v34 = vmul.f32 0.03125, %v2507_v32 }
0x1157   :  { %3377 = vrsqrt.f32 %v2510_v33  ;;  %v2511_v35 = vadd.f32 1e-12, %v2509_v34 }
0x1159   :  { %3379 = vrsqrt.f32 %v2511_v35 }
0x1161   :  { %v3378_v36 = vpop.eup %3377 }
0x1162   :  { %v2514_v41 = vmul.f32 %v3378_v36, %v2498_v16 }
0x1163   :  { %v3380_v42 = vpop.eup %3379 }
0x1164   :  { %v2520_v45 = vmul.f32 %v2899_v37, %v2514_v41  ;;  %v2515_v46 = vmul.f32 %v3380_v42, %v2499_v18 }
0x1166   :  { %v2521_v48 = vmul.f32 %v2899_v37, %v2515_v46  ;;  %v2526_v25 = vadd.f32 %v2900_v47, %v2520_v45 }
0x1168   :  { %v2527_v49 = vadd.f32 %v2900_v47, %v2521_v48  ;;  %v2714_v48 = vld [vmem:[#allocation2 + $0x1c0] sm:$0xff] }
0x116a   :  { %v2532_v50 = vpack.c.bf16 %v2527_v49, %v2526_v25 }
0x116c   :  { %3204 = vmatmul.mubr.msk.bf16.vlgmr.msra.gmra.mrb[64].mxu1 %vm41_vm0, %v2532_v50  ;;  %v2716_v50 = vld [vmem:[#allocation2 + $0x1d0] sm:$0xff] }
0x116d   :  { %3223 = vmatprep.mubr.msk.bf16.mxu1 %vm3422_vm2, %v3421_v59  ;;  %v2720_v24 = vpack.c.bf16 %v2717_v51, %v2716_v50 }
0x123f   :  { %v2577_v40 = vpop.f32.mrb[64].mxu1 }
0x1240   :  { %v2578_v1 = vadd.f32 %v2901_v0, %v2577_v40  ;;  %v3205_v2 = vpop.f32.mrb[65].mxu1 }
0x1241   :  { %v2580_v3 = vpop.f32.mrb[66].mxu1  ;;  %v2906_v2 = vld [vmem:[%s3930_s4 + $0xf] ss:$0 sm:$0xff] }
0x1242   :  { %v2586_v39 = vmul.f32 0.044715, %v2578_v1  ;;  %v2581_v4 = vadd.f32 %v2901_v0, %v2580_v3  ;;  %v3206_v5 = vpop.f32.mrb[67].mxu1  ;;  %v2584_v15 = vmul.f32 0.5, %v2578_v1 }
0x1244   :  { %v2588_v6 = vmul.f32 %v2586_v39, %v2578_v1  ;;  %v2587_v7 = vmul.f32 0.044715, %v2581_v4  ;;  %v2585_v16 = vmul.f32 0.5, %v2581_v4 }
0x1246   :  { %v2590_v23 = vmul.f32 %v2588_v6, %v2578_v1  ;;  %v2589_v8 = vmul.f32 %v2587_v7, %v2581_v4 }
0x1248   :  { %v2592_v43 = vadd.f32 %v2590_v23, %v2578_v1  ;;  %v2591_v9 = vmul.f32 %v2589_v8, %v2581_v4  ;;  %v2770_v23 = vld [vmem:[#allocation2 + $0x1e0] sm:$0xff]  ;;  %v2771_v8 = vld [vmem:[#allocation2 + $0x1e8] sm:$0xff] }
0x124a   :  { %v2594_v44 = vmul.f32 0.7978846, %v2592_v43  ;;  %v2593_v10 = vadd.f32 %v2591_v9, %v2581_v4  ;;  %v2775_v43 = vpack.c.bf16 %v2771_v8, %v2770_v23  ;;  %v2772_v9 = vld [vmem:[#allocation2 + $0x1f0] sm:$0xff] }
0x124c   :  { %3381 = vtanh.f32 %v2594_v44  ;;  %v2595_v11 = vmul.f32 0.7978846, %v2593_v10  ;;  %v2773_v44 = vld [vmem:[#allocation2 + $0x1f8] sm:$0xff] }
0x124d   :  { %v2776_v10 = vpack.c.bf16 %v2773_v44, %v2772_v9 }
0x124e   :  { %3383 = vtanh.f32 %v2595_v11  ;;  %v2907_v11 = vld [vmem:[%s3930_s4 + $0x10] ss:$0 sm:$0xff] }
0x1256   :  { %v3382_v12 = vpop.eup %3381 }
0x1257   :  { %v2598_v13 = vadd.f32 1.0, %v3382_v12 }
0x1258   :  { %v3384_v14 = vpop.eup %3383 }
0x1259   :  { %v2599_v17 = vadd.f32 1.0, %v3384_v14  ;;  %v2600_v18 = vmul.f32 %v2598_v13, %v2584_v15 }
0x125b   :  { %v2601_v19 = vmul.f32 %v2599_v17, %v2585_v16 }
0x125d   :  { %v2610_v22 = vpack.c.bf16 %v2601_v19, %v2600_v18 }
0x125f   :  { %3216 = vmatmul.mubr.msk.bf16.vlgmr.msra.gmra.mrb[64].mxu0 %vm1308_vm5, %v2610_v22 }
0x1332   :  { %v2657_v55 = vpop.f32.mrb[64].mxu0 }
0x1333   :  { %v2658_v21 = vadd.f32 %v2903_v20, %v2657_v55  ;;  %v3217_v56 = vpop.f32.mrb[65].mxu0 }
0x1334   :  { %v2660_v26 = vpop.f32.mrb[66].mxu0 }
0x1335   :  { %v2661_v27 = vadd.f32 %v2903_v20, %v2660_v26  ;;  %v3218_v28 = vpop.f32.mrb[67].mxu0  ;;  %v2664_v29 = vadd.f32 %v2658_v21, %v2526_v25  ;;  %v2715_v25 = vld [vmem:[#allocation2 + $0x1c8] sm:$0xff] }
0x1337   :  { %v2668_v30 = vsel %vm41_vm0, %v2664_v29, 0.0  ;;  %v2665_v31 = vadd.f32 %v2661_v27, %v2527_v49  ;;  %v2719_v49 = vpack.c.bf16 %v2715_v25, %v2714_v48 }
0x1338   :  { %2669 = vadd.xlane.f32.xlu1 %v2668_v30 }
0x1339   :  { %v2671_v32 = vsel %vm41_vm0, %v2665_v31, 0.0  ;;  %3220 = vmatpush3.bf16.msra.mxu1 %v2719_v49 }
0x133a   :  { %2672 = vadd.xlane.f32.xlu0 %v2671_v32  ;;  %3221 = vmatprep.subr.bf16.mxu1 %v3421_v59 }
0x133d   :  { %3222 = vmatpush3.bf16.msra.mxu1 %v2720_v24 }
0x133e   :  { %3227 = vmatprep.subr.bf16.mxu1 %v3421_v59 }
0x13c5   :  { %v2670_v33 = vpop.xlane.xlu1 %2669 }
0x13c6   :  { %v2674_v34 = vmul.f32 0.03125, %v2670_v33 }
0x13c7   :  { %v2673_v35 = vpop.xlane.xlu0 %2672 }
0x13c8   :  { %v2676_v36 = vsub.f32 %v2664_v29, %v2674_v34  ;;  %v2675_v37 = vmul.f32 0.03125, %v2673_v35 }
0x13ca   :  { %v2677_v41 = vsub.f32 %v2665_v31, %v2675_v37  ;;  %v2678_v42 = vmul.f32 %v2676_v36, %v2676_v36 }
0x13cc   :  { %v2680_v45 = vsel %vm41_vm0, %v2678_v42, 0.0  ;;  %v2679_v46 = vmul.f32 %v2677_v41, %v2677_v41 }
0x13cd   :  { %2681 = vadd.xlane.f32.xlu1 %v2680_v45 }
0x13ce   :  { %v2683_v47 = vsel %vm41_vm0, %v2679_v46, 0.0 }
0x13cf   :  { %2684 = vadd.xlane.f32.xlu0 %v2683_v47 }
0x145a   :  { %v2682_v52 = vpop.xlane.xlu1 %2681 }
0x145b   :  { %v2686_v53 = vmul.f32 0.03125, %v2682_v52 }
0x145c   :  { %v2685_v38 = vpop.xlane.xlu0 %2684 }
0x145d   :  { %v2688_v54 = vadd.f32 1e-12, %v2686_v53  ;;  %v2687_v57 = vmul.f32 0.03125, %v2685_v38 }
0x145f   :  { %3385 = vrsqrt.f32 %v2688_v54  ;;  %v2689_v58 = vadd.f32 1e-12, %v2687_v57 }
0x1461   :  { %3387 = vrsqrt.f32 %v2689_v58 }
0x1469   :  { %v3386_v60 = vpop.eup %3385 }
0x146a   :  { %v2692_v61 = vmul.f32 %v3386_v60, %v2676_v36 }
0x146b   :  { %v3388_v62 = vpop.eup %3387 }
0x146c   :  { %v2693_v0 = vmul.f32 %v3388_v62, %v2677_v41  ;;  %v2698_v40 = vmul.f32 %v2905_v63, %v2692_v61 }
0x146e   :  { %v2699_v1 = vmul.f32 %v2905_v63, %v2693_v0  ;;  %v2704_v39 = vadd.f32 %v2906_v2, %v2698_v40 }
0x1470   :  { %v2705_v3 = vadd.f32 %v2906_v2, %v2699_v1 }
0x1472   :  { %v2708_v4 = vrot.slane %v2705_v3, 7 }
0x1474   :  { %v2710_v5 = vsel %vm2709_vm6, %v2708_v4, %v2704_v39 }
0x1475   :  { %v2713_v6 = vsel %vm2712_vm7, %v2710_v5, 0.0 }
0x1476   :  { %v2718_v7 = vpack.c.bf16 %v2713_v6, %v2713_v6 }
0x1478   :  { %3224 = vmatmul.mubr.msk.bf16.vlgmr.msra.gmra.mrb[68].mxu1 %vm41_vm0, %v2718_v7 }
0x1479   :  { %3231 = vmatprep.mubr.msk.bf16.mxu1 %vm3422_vm2, %v3421_v59  ;;  %3228 = vmatpush3.bf16.msra.mxu1 %v2775_v43 }
0x147a   :  { %3229 = vmatprep.subr.bf16.mxu1 %v3421_v59  ;;  %v2909_v59 = vld [vmem:[%s3930_s4 + $0x11] ss:$0 sm:$0xff] }
0x147d   :  { %3230 = vmatpush3.bf16.msra.mxu1 %v2776_v10 }
0x154b   :  { %v2763_v12 = vpop.f32.mrb[68].mxu1 }
0x154c   :  { %v2764_v13 = vadd.f32 %v2907_v11, %v2763_v12  ;;  %v3225_v14 = vpop.f32.mrb[69].mxu1 }
0x154d   :  { %v2766_v15 = vpop.f32.mrb[70].mxu1 }
0x154e   :  { %3389 = vtanh.f32 %v2764_v13  ;;  %v3226_v16 = vpop.f32.mrb[71].mxu1 }
0x1558   :  { %v3390_v17 = vpop.eup %3389 }
0x1559   :  { %v2774_v18 = vpack.c.bf16 %v3390_v17, %v3390_v17 }
0x155b   :  { %3232 = vmatmul.mubr.msk.bf16.vlgmr.msra.gmra.mrb[72].mxu1 %vm41_vm0, %v2774_v18 }
0x162e   :  { %v2819_v19 = vpop.f32.mrb[72].mxu1 }
0x162f   :  { %v2820_v22 = vadd.f32 %v2909_v59, %v2819_v19  ;;  %v3233_v20 = vpop.f32.mrb[73].mxu1 }
0x1630   :  { %v2822_v55 = vpop.f32.mrb[74].mxu1 }
0x1631   :  { %2825 = vst [vmem:[%s3931_s5] sm:$0xff] %v2820_v22  ;;  %v3234_v21 = vpop.f32.mrb[75].mxu1 }
0x1632   :  { %2830 = vsyncpa [#allocation3], 1 }

</bundles_post_ra>
